<compile_context>
chip_gen: v6e
topology: v6e:2x2x1
jax: 0.10.0
libtpu: 0.0.40
codegen_flags: <defaults>
</compile_context>

<pallas_src>
import jax
import jax.numpy as jnp
from jax.experimental import pallas as pl
from jax.experimental.pallas import tpu as pltpu


# ---------------------------------------------------------------------------
# Generic tiled linear kernel: y = x @ W^T + b   (W passed pre-transposed).
# Used for (a) the hoisted LSTM layer-0 input projection and (b) the output
# vocab projection.  Matmul operands cast to bf16, accumulation in f32.
# ---------------------------------------------------------------------------
def _linear_kernel(x_ref, w_ref, b_ref, o_ref):
    x = x_ref[...].astype(jnp.bfloat16)
    o_ref[...] = (
        jnp.dot(x, w_ref[...], preferred_element_type=jnp.float32)
        + b_ref[...]
    )


def linear(x_2d, w_t, bias, *, max_tm=256, max_tn=512):
    """x_2d:(M,K) f32, w_t:(K,N) bf16, bias:(1,N) f32 -> (M,N) f32."""
    M, K = x_2d.shape
    N = w_t.shape[1]
    # Tile M and N (K kept whole: hidden sizes here are small; a K grid with a
    # VMEM accumulator would be added for very large K).
    tm = M if M <= max_tm else max_tm
    tn = N if N <= max_tn else max_tn
    grid = (pl.cdiv(M, tm), pl.cdiv(N, tn))
    return pl.pallas_call(
        _linear_kernel,
        out_shape=jax.ShapeDtypeStruct((M, N), jnp.float32),
        grid=grid,
        in_specs=[
            pl.BlockSpec((tm, K), lambda i, j: (i, 0)),
            pl.BlockSpec((K, tn), lambda i, j: (0, j)),
            pl.BlockSpec((1, tn), lambda i, j: (0, j)),
        ],
        out_specs=pl.BlockSpec((tm, tn), lambda i, j: (i, j)),
        compiler_params=pltpu.CompilerParams(
            dimension_semantics=("parallel", "parallel"),  # v7x: both TCs
            vmem_limit_bytes=32 * 1024 * 1024,
        ),
    )(x_2d, w_t, bias)


# ---------------------------------------------------------------------------
# Fused 2-layer LSTM recurrence.  Grid iterates over time chunks; the inner
# statically-unrolled loop walks the Tc steps of a chunk.  h/c for both layers
# are carried in VMEM scratch across chunks.
# ---------------------------------------------------------------------------
def _fused_lstm_kernel(xp0_ref, whh0_ref, wih1_ref, whh1_ref, b1_ref,
                       y_ref, hN_ref, cN_ref,
                       h0_scr, c0_scr, h1_scr, c1_scr):
    c_idx = pl.program_id(0)

    @pl.when(c_idx == 0)
    def _():
        h0_scr[...] = jnp.zeros_like(h0_scr)
        c0_scr[...] = jnp.zeros_like(c0_scr)
        h1_scr[...] = jnp.zeros_like(h1_scr)
        c1_scr[...] = jnp.zeros_like(c1_scr)

    H = h0_scr.shape[-1]
    Tc = y_ref.shape[0]
    b1 = b1_ref[...]

    def cell(gates, c):
        # NOTE: with H a multiple of 128 (real configs) these slices are
        # whole-vreg views; at the toy H=32 they are lane-masked but cheap.
        i = jax.nn.sigmoid(gates[:, 0 * H:1 * H])
        f = jax.nn.sigmoid(gates[:, 1 * H:2 * H])
        g = jnp.tanh(gates[:, 2 * H:3 * H])
        o = jax.nn.sigmoid(gates[:, 3 * H:4 * H])
        c_new = f * c + i * g
        h_new = o * jnp.tanh(c_new)
        return h_new, c_new

    h0 = h0_scr[...]
    c0 = c0_scr[...]
    h1 = h1_scr[...]
    c1 = c1_scr[...]

    # Statically unrolled loop over the time chunk (Tc is compile-time const).
    for s in range(Tc):
        # Layer 0: input projection hoisted -> only the recurrent matmul here.
        g0 = xp0_ref[s] + jnp.dot(
            h0.astype(jnp.bfloat16), whh0_ref[...],
            preferred_element_type=jnp.float32)
        h0, c0 = cell(g0, c0)
        # Layer 1: consumes layer-0 hidden directly (no HBM round-trip).
        g1 = (jnp.dot(h0.astype(jnp.bfloat16), wih1_ref[...],
                      preferred_element_type=jnp.float32)
              + jnp.dot(h1.astype(jnp.bfloat16), whh1_ref[...],
                        preferred_element_type=jnp.float32)
              + b1)
        h1, c1 = cell(g1, c1)
        y_ref[s] = h1

    # Carry state to the next time chunk.
    h0_scr[...] = h0
    c0_scr[...] = c0
    h1_scr[...] = h1
    c1_scr[...] = c1

    # Final (h_n, c_n) written only once, on the last chunk.
    @pl.when(c_idx == pl.num_programs(0) - 1)
    def _():
        hN_ref[0] = h0
        hN_ref[1] = h1
        cN_ref[0] = c0
        cN_ref[1] = c1


def _pick_time_chunk(T, max_chunk=32):
    for c in range(min(T, max_chunk), 0, -1):
        if T % c == 0:
            return c
    return 1


def fused_lstm2(xproj0, w_hh0_t, w_ih1_t, w_hh1_t, b1):
    """xproj0: (T,B,4H) f32 (layer-0 x@W_ih^T + b0, precomputed).
    Returns (y1:(T,B,H), h_n:(2,B,H), c_n:(2,B,H))."""
    T, B, G = xproj0.shape
    H = G // 4
    Tc = _pick_time_chunk(T)
    out_shapes = (
        jax.ShapeDtypeStruct((T, B, H), jnp.float32),
        jax.ShapeDtypeStruct((2, B, H), jnp.float32),
        jax.ShapeDtypeStruct((2, B, H), jnp.float32),
    )
    return pl.pallas_call(
        _fused_lstm_kernel,
        out_shape=out_shapes,
        grid_spec=pltpu.PrefetchScalarGridSpec(
            num_scalar_prefetch=0,
            grid=(T // Tc,),
            in_specs=[
                pl.BlockSpec((Tc, B, G), lambda c: (c, 0, 0)),   # xproj0 chunk
                # NOTE: at real H these loop-invariant weight specs should get
                # pipeline_mode=pl.Buffered(1) so they are not double-buffered
                # (important for v7x's 64 MiB VMEM); with T chunked to one/few
                # grid steps at these sizes they are fetched once anyway.
                pl.BlockSpec((H, G), lambda c: (0, 0)),          # W_hh0^T bf16
                pl.BlockSpec((H, G), lambda c: (0, 0)),          # W_ih1^T bf16
                pl.BlockSpec((H, G), lambda c: (0, 0)),          # W_hh1^T bf16
                pl.BlockSpec((1, G), lambda c: (0, 0)),          # b1 (f32)
            ],
            out_specs=[
                pl.BlockSpec((Tc, B, H), lambda c: (c, 0, 0)),   # y (layer 1)
                pl.BlockSpec((2, B, H), lambda c: (0, 0, 0)),    # h_n
                pl.BlockSpec((2, B, H), lambda c: (0, 0, 0)),    # c_n
            ],
            scratch_shapes=[pltpu.VMEM((B, H), jnp.float32)] * 4,
        ),
        compiler_params=pltpu.CompilerParams(
            dimension_semantics=("arbitrary",),   # sequential state carry
            vmem_limit_bytes=32 * 1024 * 1024,
        ),
    )(xproj0, w_hh0_t, w_ih1_t, w_hh1_t, b1)


# ---------------------------------------------------------------------------
# Parameters + model wrapper (mirrors SimpleNLPModel.forward, eval mode)
# ---------------------------------------------------------------------------
def init_params(key, vocab_size, embedding_dim, hidden_dim, output_dim):
    ks = jax.random.split(key, 16)
    s = 1.0 / jnp.sqrt(hidden_dim)

    def u(k, shape):
        return jax.random.uniform(k, shape, jnp.float32, -s, s)

    return {
        # torch.nn.Embedding default init: N(0, 1)
        "embedding": jax.random.normal(ks[0], (vocab_size, embedding_dim),
                                       jnp.float32),
        # LSTM layer 0 (weights stored pre-transposed, bf16 for the MXU)
        "w_ih0_t": u(ks[1], (embedding_dim, 4 * hidden_dim)).astype(jnp.bfloat16),
        "w_hh0_t": u(ks[2], (hidden_dim, 4 * hidden_dim)).astype(jnp.bfloat16),
        # b_ih + b_hh fused; sum of two U(-s,s) draws to match torch init dist.
        "b0": u(ks[3], (1, 4 * hidden_dim)) + u(ks[4], (1, 4 * hidden_dim)),
        # LSTM layer 1
        "w_ih1_t": u(ks[5], (hidden_dim, 4 * hidden_dim)).astype(jnp.bfloat16),
        "w_hh1_t": u(ks[6], (hidden_dim, 4 * hidden_dim)).astype(jnp.bfloat16),
        "b1": u(ks[7], (1, 4 * hidden_dim)) + u(ks[8], (1, 4 * hidden_dim)),
        # Output linear
        "w_out_t": u(ks[9], (hidden_dim, output_dim)).astype(jnp.bfloat16),
        "b_out": u(ks[10], (1, output_dim)),
    }


@jax.jit
def simple_nlp_forward(params, tokens):
    """tokens: (B, T) int32.
    Returns (predictions:(B,T,V), (h_n:(2,B,H), c_n:(2,B,H)))."""
    B, T = tokens.shape
    H = params["w_hh0_t"].shape[0]

    # Embedding lookup, gathered directly in time-major order (T, B, E).
    # TODO(synk): could fold the gather into the projection pallas_call via
    # scalar prefetch + pl.Element row gather; kept as an XLA gather here.
    x_tbe = jnp.take(params["embedding"], tokens.T, axis=0)        # (T, B, E)
    E = x_tbe.shape[-1]

    # Layer-0 input projection hoisted out of the recurrence: one big matmul.
    xproj0 = linear(x_tbe.reshape(T * B, E),
                    params["w_ih0_t"], params["b0"]).reshape(T, B, 4 * H)

    # Fused 2-layer LSTM recurrence (inter-layer dropout skipped: eval mode).
    y1, h_n, c_n = fused_lstm2(xproj0, params["w_hh0_t"],
                               params["w_ih1_t"], params["w_hh1_t"],
                               params["b1"])

    # Output vocab projection on batch-major layout.
    y_bth = jnp.transpose(y1, (1, 0, 2))                            # (B, T, H)
    logits = linear(y_bth.reshape(B * T, H),
                    params["w_out_t"], params["b_out"])
    predictions = logits.reshape(B, T, -1)
    return predictions, (h_n, c_n)


if __name__ == "__main__":
    VOCAB = 128
    EMB = 32
    HID = 32
    BATCH = 8   # >= 8 keeps (B, .) tiles at full sublane utilization
    SEQ = 8

    key = jax.random.PRNGKey(0)
    pkey, dkey = jax.random.split(key)
    params = init_params(pkey, VOCAB, EMB, HID, VOCAB)
    tokens = jax.random.randint(dkey, (BATCH, SEQ), 0, VOCAB, dtype=jnp.int32)

    preds, (h_n, c_n) = simple_nlp_forward(params, tokens)
    jax.block_until_ready((preds, h_n, c_n))

    assert preds.shape == (BATCH, SEQ, VOCAB)
    assert h_n.shape == (2, BATCH, HID)
    assert c_n.shape == (2, BATCH, HID)
    print("KERNEL_OK")
</pallas_src>

<mosaic_0001>
module attributes {stable_mosaic.version = 11 : i64} {
  func.func @_linear_kernel(%arg0: i32, %arg1: i32, %arg2: memref<64x32xf32, #tpu.memory_space<vmem>>, %arg3: memref<32x128xbf16, #tpu.memory_space<vmem>>, %arg4: memref<1x128xf32, #tpu.memory_space<vmem>>, %arg5: memref<64x128xf32, #tpu.memory_space<vmem>>) attributes {dimension_semantics = [#tpu.dimension_semantics<parallel>, #tpu.dimension_semantics<parallel>], iteration_bounds = array<i64: 1, 1>, scalar_prefetch = 0 : i64, scratch_operands = 0 : i64, tpu.core_type = #tpu.core_type<tc>, window_params = [{transform_indices = @transform_0, window_bounds = array<i64: 64, 32>}, {transform_indices = @transform_1, window_bounds = array<i64: 32, 128>}, {transform_indices = @transform_2, window_bounds = array<i64: 1, 128>}, {transform_indices = @transform_3, window_bounds = array<i64: 64, 128>}]} {
    %c0 = arith.constant 0 : index
    %c0_0 = arith.constant 0 : index
    %0 = vector.load %arg2[%c0, %c0_0] : memref<64x32xf32, #tpu.memory_space<vmem>>, vector<64x32xf32>
    %1 = arith.truncf %0 : vector<64x32xf32> to vector<64x32xbf16>
    %c0_1 = arith.constant 0 : index
    %c0_2 = arith.constant 0 : index
    %2 = vector.load %arg3[%c0_1, %c0_2] : memref<32x128xbf16, #tpu.memory_space<vmem>>, vector<32x128xbf16>
    %cst = arith.constant dense<0.000000e+00> : vector<64x128xf32>
    %3 = tpu.matmul %1, %2, %cst {dimension_numbers = #tpu.dot_dimension_numbers<[1], [0], [0], [1], [0, 0, 1, 1], [], []>} : vector<64x32xbf16>, vector<32x128xbf16>, vector<64x128xf32> -> vector<64x128xf32>
    %c0_3 = arith.constant 0 : index
    %c0_4 = arith.constant 0 : index
    %4 = vector.load %arg4[%c0_3, %c0_4] : memref<1x128xf32, #tpu.memory_space<vmem>>, vector<1x128xf32>
    %5 = vector.broadcast %4 : vector<1x128xf32> to vector<64x128xf32>
    %6 = arith.addf %3, %5 : vector<64x128xf32>
    %c0_5 = arith.constant 0 : index
    %c0_6 = arith.constant 0 : index
    %7 = vector.load %arg5[%c0_5, %c0_6] : memref<64x128xf32, #tpu.memory_space<vmem>>, vector<64x128xf32>
    tpu.vector_store %arg5[%c0_5, %c0_6], %6 {strides = array<i32>} : memref<64x128xf32, #tpu.memory_space<vmem>>, vector<64x128xf32>,
    return
  }
  func.func @transform_0(%arg0: i32, %arg1: i32) -> (i32, i32) {
    %c0_i32 = arith.constant 0 : i32
    %c0_i32_0 = arith.constant 0 : i32
    return %arg0, %c0_i32 : i32, i32
  }
  func.func @transform_1(%arg0: i32, %arg1: i32) -> (i32, i32) {
    %c0_i32 = arith.constant 0 : i32
    %c0_i32_0 = arith.constant 0 : i32
    return %c0_i32, %arg1 : i32, i32
  }
  func.func @transform_2(%arg0: i32, %arg1: i32) -> (i32, i32) {
    %c0_i32 = arith.constant 0 : i32
    %c0_i32_0 = arith.constant 0 : i32
    return %c0_i32, %arg1 : i32, i32
  }
  func.func @transform_3(%arg0: i32, %arg1: i32) -> (i32, i32) {
    %c0_i32 = arith.constant 0 : i32
    return %arg0, %arg1 : i32, i32
  }
}

module attributes {stable_mosaic.version = 11 : i64} {
  func.func @_linear_kernel(%arg0: i32, %arg1: i32, %arg2: memref<64x32xf32, #tpu.memory_space<vmem>>, %arg3: memref<32x128xbf16, #tpu.memory_space<vmem>>, %arg4: memref<1x128xf32, #tpu.memory_space<vmem>>, %arg5: memref<64x128xf32, #tpu.memory_space<vmem>>) attributes {dimension_semantics = [#tpu.dimension_semantics<parallel>, #tpu.dimension_semantics<parallel>], iteration_bounds = array<i64: 1, 1>, scalar_prefetch = 0 : i64, scratch_operands = 0 : i64, tpu.core_type = #tpu.core_type<tc>, window_params = [{transform_indices = @transform_0, window_bounds = array<i64: 64, 32>}, {transform_indices = @transform_1, window_bounds = array<i64: 32, 128>}, {transform_indices = @transform_2, window_bounds = array<i64: 1, 128>}, {transform_indices = @transform_3, window_bounds = array<i64: 64, 128>}]} {
    %c0 = arith.constant 0 : index
    %c0_0 = arith.constant 0 : index
    %0 = vector.load %arg2[%c0, %c0_0] : memref<64x32xf32, #tpu.memory_space<vmem>>, vector<64x32xf32>
    %1 = arith.truncf %0 : vector<64x32xf32> to vector<64x32xbf16>
    %c0_1 = arith.constant 0 : index
    %c0_2 = arith.constant 0 : index
    %2 = vector.load %arg3[%c0_1, %c0_2] : memref<32x128xbf16, #tpu.memory_space<vmem>>, vector<32x128xbf16>
    %cst = arith.constant dense<0.000000e+00> : vector<64x128xf32>
    %3 = tpu.matmul %1, %2, %cst {dimension_numbers = #tpu.dot_dimension_numbers<[1], [0], [0], [1], [0, 0, 1, 1], [], []>} : vector<64x32xbf16>, vector<32x128xbf16>, vector<64x128xf32> -> vector<64x128xf32>
    %c0_3 = arith.constant 0 : index
    %c0_4 = arith.constant 0 : index
    %4 = vector.load %arg4[%c0_3, %c0_4] : memref<1x128xf32, #tpu.memory_space<vmem>>, vector<1x128xf32>
    %5 = vector.broadcast %4 : vector<1x128xf32> to vector<64x128xf32>
    %6 = arith.addf %3, %5 : vector<64x128xf32>
    %c0_5 = arith.constant 0 : index
    %c0_6 = arith.constant 0 : index
    %7 = vector.load %arg5[%c0_5, %c0_6] : memref<64x128xf32, #tpu.memory_space<vmem>>, vector<64x128xf32>
    tpu.vector_store %arg5[%c0_5, %c0_6], %6 {strides = array<i32>} : memref<64x128xf32, #tpu.memory_space<vmem>>, vector<64x128xf32>,
    return
  }
  func.func @transform_0(%arg0: i32, %arg1: i32) -> (i32, i32) {
    %c0_i32 = arith.constant 0 : i32
    %c0_i32_0 = arith.constant 0 : i32
    return %arg0, %c0_i32 : i32, i32
  }
  func.func @transform_1(%arg0: i32, %arg1: i32) -> (i32, i32) {
    %c0_i32 = arith.constant 0 : i32
    %c0_i32_0 = arith.constant 0 : i32
    return %c0_i32, %arg1 : i32, i32
  }
  func.func @transform_2(%arg0: i32, %arg1: i32) -> (i32, i32) {
    %c0_i32 = arith.constant 0 : i32
    %c0_i32_0 = arith.constant 0 : i32
    return %c0_i32, %arg1 : i32, i32
  }
  func.func @transform_3(%arg0: i32, %arg1: i32) -> (i32, i32) {
    %c0_i32 = arith.constant 0 : i32
    return %arg0, %arg1 : i32, i32
  }
}

module attributes {stable_mosaic.version = 11 : i64} {
  func.func @_fused_lstm_kernel(%arg0: i32, %arg1: memref<8x8x128xf32, #tpu.memory_space<vmem>>, %arg2: memref<32x128xbf16, #tpu.memory_space<vmem>>, %arg3: memref<32x128xbf16, #tpu.memory_space<vmem>>, %arg4: memref<32x128xbf16, #tpu.memory_space<vmem>>, %arg5: memref<1x128xf32, #tpu.memory_space<vmem>>, %arg6: memref<8x8x32xf32, #tpu.memory_space<vmem>>, %arg7: memref<2x8x32xf32, #tpu.memory_space<vmem>>, %arg8: memref<2x8x32xf32, #tpu.memory_space<vmem>>, %arg9: memref<8x32xf32, #tpu.memory_space<vmem>>, %arg10: memref<8x32xf32, #tpu.memory_space<vmem>>, %arg11: memref<8x32xf32, #tpu.memory_space<vmem>>, %arg12: memref<8x32xf32, #tpu.memory_space<vmem>>) attributes {dimension_semantics = [#tpu.dimension_semantics<arbitrary>], iteration_bounds = array<i64: 1>, scalar_prefetch = 0 : i64, scratch_operands = 4 : i64, tpu.core_type = #tpu.core_type<tc>, window_params = [{transform_indices = @transform_0, window_bounds = array<i64: 8, 8, 128>}, {pipeline_mode = #tpu.pipeline_mode<synchronous>, transform_indices = @transform_1, window_bounds = array<i64: 32, 128>}, {pipeline_mode = #tpu.pipeline_mode<synchronous>, transform_indices = @transform_2, window_bounds = array<i64: 32, 128>}, {pipeline_mode = #tpu.pipeline_mode<synchronous>, transform_indices = @transform_3, window_bounds = array<i64: 32, 128>}, {pipeline_mode = #tpu.pipeline_mode<synchronous>, transform_indices = @transform_4, window_bounds = array<i64: 1, 128>}, {transform_indices = @transform_5, window_bounds = array<i64: 8, 8, 32>}, {pipeline_mode = #tpu.pipeline_mode<synchronous>, transform_indices = @transform_6, window_bounds = array<i64: 2, 8, 32>}, {pipeline_mode = #tpu.pipeline_mode<synchronous>, transform_indices = @transform_7, window_bounds = array<i64: 2, 8, 32>}]} {
    %c0_i32 = arith.constant 0 : i32
    %0 = arith.cmpi eq, %arg0, %c0_i32 : i32
    %1 = arith.extui %0 : i1 to i32
    %c0_i32_0 = arith.constant 0 : i32
    %2 = arith.cmpi ne, %1, %c0_i32_0 : i32
    scf.if %2 {
      %cst_180 = arith.constant 0.000000e+00 : f32
      %559 = vector.broadcast %cst_180 : f32 to vector<8x32xf32>
      %c0_181 = arith.constant 0 : index
      %c0_182 = arith.constant 0 : index
      %560 = vector.load %arg9[%c0_181, %c0_182] : memref<8x32xf32, #tpu.memory_space<vmem>>, vector<8x32xf32>
      tpu.vector_store %arg9[%c0_181, %c0_182], %559 {strides = array<i32>} : memref<8x32xf32, #tpu.memory_space<vmem>>, vector<8x32xf32>,
      %cst_183 = arith.constant 0.000000e+00 : f32
      %561 = vector.broadcast %cst_183 : f32 to vector<8x32xf32>
      %c0_184 = arith.constant 0 : index
      %c0_185 = arith.constant 0 : index
      %562 = vector.load %arg10[%c0_184, %c0_185] : memref<8x32xf32, #tpu.memory_space<vmem>>, vector<8x32xf32>
      tpu.vector_store %arg10[%c0_184, %c0_185], %561 {strides = array<i32>} : memref<8x32xf32, #tpu.memory_space<vmem>>, vector<8x32xf32>,
      %cst_186 = arith.constant 0.000000e+00 : f32
      %563 = vector.broadcast %cst_186 : f32 to vector<8x32xf32>
      %c0_187 = arith.constant 0 : index
      %c0_188 = arith.constant 0 : index
      %564 = vector.load %arg11[%c0_187, %c0_188] : memref<8x32xf32, #tpu.memory_space<vmem>>, vector<8x32xf32>
      tpu.vector_store %arg11[%c0_187, %c0_188], %563 {strides = array<i32>} : memref<8x32xf32, #tpu.memory_space<vmem>>, vector<8x32xf32>,
      %cst_189 = arith.constant 0.000000e+00 : f32
      %565 = vector.broadcast %cst_189 : f32 to vector<8x32xf32>
      %c0_190 = arith.constant 0 : index
      %c0_191 = arith.constant 0 : index
      %566 = vector.load %arg12[%c0_190, %c0_191] : memref<8x32xf32, #tpu.memory_space<vmem>>, vector<8x32xf32>
      tpu.vector_store %arg12[%c0_190, %c0_191], %565 {strides = array<i32>} : memref<8x32xf32, #tpu.memory_space<vmem>>, vector<8x32xf32>,
    } else {
    }
    %c0 = arith.constant 0 : index
    %c0_1 = arith.constant 0 : index
    %3 = vector.load %arg5[%c0, %c0_1] : memref<1x128xf32, #tpu.memory_space<vmem>>, vector<1x128xf32>
    %c0_2 = arith.constant 0 : index
    %c0_3 = arith.constant 0 : index
    %4 = vector.load %arg9[%c0_2, %c0_3] : memref<8x32xf32, #tpu.memory_space<vmem>>, vector<8x32xf32>
    %c0_4 = arith.constant 0 : index
    %c0_5 = arith.constant 0 : index
    %5 = vector.load %arg10[%c0_4, %c0_5] : memref<8x32xf32, #tpu.memory_space<vmem>>, vector<8x32xf32>
    %c0_6 = arith.constant 0 : index
    %c0_7 = arith.constant 0 : index
    %6 = vector.load %arg11[%c0_6, %c0_7] : memref<8x32xf32, #tpu.memory_space<vmem>>, vector<8x32xf32>
    %c0_8 = arith.constant 0 : index
    %c0_9 = arith.constant 0 : index
    %7 = vector.load %arg12[%c0_8, %c0_9] : memref<8x32xf32, #tpu.memory_space<vmem>>, vector<8x32xf32>
    %c0_10 = arith.constant 0 : index
    %c0_11 = arith.constant 0 : index
    %c0_12 = arith.constant 0 : index
    %8 = vector.load %arg1[%c0_10, %c0_11, %c0_12] : memref<8x8x128xf32, #tpu.memory_space<vmem>>, vector<1x8x128xf32>
    %9 = vector.shape_cast %8 : vector<1x8x128xf32> to vector<8x128xf32>
    %10 = arith.truncf %4 : vector<8x32xf32> to vector<8x32xbf16>
    %c0_13 = arith.constant 0 : index
    %c0_14 = arith.constant 0 : index
    %11 = vector.load %arg2[%c0_13, %c0_14] : memref<32x128xbf16, #tpu.memory_space<vmem>>, vector<32x128xbf16>
    %cst = arith.constant dense<0.000000e+00> : vector<8x128xf32>
    %12 = tpu.matmul %10, %11, %cst {dimension_numbers = #tpu.dot_dimension_numbers<[1], [0], [0], [1], [0, 0, 1, 1], [], []>} : vector<8x32xbf16>, vector<32x128xbf16>, vector<8x128xf32> -> vector<8x128xf32>
    %13 = arith.addf %9, %12 : vector<8x128xf32>
    %14 = vector.extract_strided_slice %13 {offsets = [0, 0], sizes = [8, 32], strides = [1, 1]} : vector<8x128xf32> to vector<8x32xf32>
    %15 = arith.negf %14 : vector<8x32xf32>
    %16 = math.exp %15 : vector<8x32xf32>
    %cst_15 = arith.constant 1.000000e+00 : f32
    %17 = vector.broadcast %cst_15 : f32 to vector<8x32xf32>
    %18 = arith.addf %17, %16 : vector<8x32xf32>
    %19 = arith.divf %17, %18 : vector<8x32xf32>
    %20 = vector.extract_strided_slice %13 {offsets = [0, 32], sizes = [8, 32], strides = [1, 1]} : vector<8x128xf32> to vector<8x32xf32>
    %21 = arith.negf %20 : vector<8x32xf32>
    %22 = math.exp %21 : vector<8x32xf32>
    %cst_16 = arith.constant 1.000000e+00 : f32
    %23 = vector.broadcast %cst_16 : f32 to vector<8x32xf32>
    %24 = arith.addf %23, %22 : vector<8x32xf32>
    %25 = arith.divf %23, %24 : vector<8x32xf32>
    %26 = vector.extract_strided_slice %13 {offsets = [0, 64], sizes = [8, 32], strides = [1, 1]} : vector<8x128xf32> to vector<8x32xf32>
    %27 = math.tanh %26 : vector<8x32xf32>
    %28 = vector.extract_strided_slice %13 {offsets = [0, 96], sizes = [8, 32], strides = [1, 1]} : vector<8x128xf32> to vector<8x32xf32>
    %29 = arith.negf %28 : vector<8x32xf32>
    %30 = math.exp %29 : vector<8x32xf32>
    %cst_17 = arith.constant 1.000000e+00 : f32
    %31 = vector.broadcast %cst_17 : f32 to vector<8x32xf32>
    %32 = arith.addf %31, %30 : vector<8x32xf32>
    %33 = arith.divf %31, %32 : vector<8x32xf32>
    %34 = arith.mulf %25, %5 : vector<8x32xf32>
    %35 = arith.mulf %19, %27 : vector<8x32xf32>
    %36 = arith.addf %34, %35 : vector<8x32xf32>
    %37 = math.tanh %36 : vector<8x32xf32>
    %38 = arith.mulf %33, %37 : vector<8x32xf32>
    %39 = arith.truncf %38 : vector<8x32xf32> to vector<8x32xbf16>
    %c0_18 = arith.constant 0 : index
    %c0_19 = arith.constant 0 : index
    %40 = vector.load %arg3[%c0_18, %c0_19] : memref<32x128xbf16, #tpu.memory_space<vmem>>, vector<32x128xbf16>
    %cst_20 = arith.constant dense<0.000000e+00> : vector<8x128xf32>
    %41 = tpu.matmul %39, %40, %cst_20 {dimension_numbers = #tpu.dot_dimension_numbers<[1], [0], [0], [1], [0, 0, 1, 1], [], []>} : vector<8x32xbf16>, vector<32x128xbf16>, vector<8x128xf32> -> vector<8x128xf32>
    %42 = arith.truncf %6 : vector<8x32xf32> to vector<8x32xbf16>
    %c0_21 = arith.constant 0 : index
    %c0_22 = arith.constant 0 : index
    %43 = vector.load %arg4[%c0_21, %c0_22] : memref<32x128xbf16, #tpu.memory_space<vmem>>, vector<32x128xbf16>
    %cst_23 = arith.constant dense<0.000000e+00> : vector<8x128xf32>
    %44 = tpu.matmul %42, %43, %cst_23 {dimension_numbers = #tpu.dot_dimension_numbers<[1], [0], [0], [1], [0, 0, 1, 1], [], []>} : vector<8x32xbf16>, vector<32x128xbf16>, vector<8x128xf32> -> vector<8x128xf32>
    %45 = arith.addf %41, %44 : vector<8x128xf32>
    %46 = vector.broadcast %3 : vector<1x128xf32> to vector<8x128xf32>
    %47 = arith.addf %45, %46 : vector<8x128xf32>
    %48 = vector.extract_strided_slice %47 {offsets = [0, 0], sizes = [8, 32], strides = [1, 1]} : vector<8x128xf32> to vector<8x32xf32>
    %49 = arith.negf %48 : vector<8x32xf32>
    %50 = math.exp %49 : vector<8x32xf32>
    %cst_24 = arith.constant 1.000000e+00 : f32
    %51 = vector.broadcast %cst_24 : f32 to vector<8x32xf32>
    %52 = arith.addf %51, %50 : vector<8x32xf32>
    %53 = arith.divf %51, %52 : vector<8x32xf32>
    %54 = vector.extract_strided_slice %47 {offsets = [0, 32], sizes = [8, 32], strides = [1, 1]} : vector<8x128xf32> to vector<8x32xf32>
    %55 = arith.negf %54 : vector<8x32xf32>
    %56 = math.exp %55 : vector<8x32xf32>
    %cst_25 = arith.constant 1.000000e+00 : f32
    %57 = vector.broadcast %cst_25 : f32 to vector<8x32xf32>
    %58 = arith.addf %57, %56 : vector<8x32xf32>
    %59 = arith.divf %57, %58 : vector<8x32xf32>
    %60 = vector.extract_strided_slice %47 {offsets = [0, 64], sizes = [8, 32], strides = [1, 1]} : vector<8x128xf32> to vector<8x32xf32>
    %61 = math.tanh %60 : vector<8x32xf32>
    %62 = vector.extract_strided_slice %47 {offsets = [0, 96], sizes = [8, 32], strides = [1, 1]} : vector<8x128xf32> to vector<8x32xf32>
    %63 = arith.negf %62 : vector<8x32xf32>
    %64 = math.exp %63 : vector<8x32xf32>
    %cst_26 = arith.constant 1.000000e+00 : f32
    %65 = vector.broadcast %cst_26 : f32 to vector<8x32xf32>
    %66 = arith.addf %65, %64 : vector<8x32xf32>
    %67 = arith.divf %65, %66 : vector<8x32xf32>
    %68 = arith.mulf %59, %7 : vector<8x32xf32>
    %69 = arith.mulf %53, %61 : vector<8x32xf32>
    %70 = arith.addf %68, %69 : vector<8x32xf32>
    %71 = math.tanh %70 : vector<8x32xf32>
    %72 = arith.mulf %67, %71 : vector<8x32xf32>
    %c0_27 = arith.constant 0 : index
    %c0_28 = arith.constant 0 : index
    %c0_29 = arith.constant 0 : index
    %73 = vector.load %arg6[%c0_27, %c0_28, %c0_29] : memref<8x8x32xf32, #tpu.memory_space<vmem>>, vector<1x8x32xf32>
    %74 = vector.shape_cast %73 : vector<1x8x32xf32> to vector<8x32xf32>
    %75 = vector.shape_cast %72 : vector<8x32xf32> to vector<1x8x32xf32>
    tpu.vector_store %arg6[%c0_27, %c0_28, %c0_29], %75 {strides = array<i32>} : memref<8x8x32xf32, #tpu.memory_space<vmem>>, vector<1x8x32xf32>,
    %c1 = arith.constant 1 : index
    %c0_30 = arith.constant 0 : index
    %c0_31 = arith.constant 0 : index
    %76 = vector.load %arg1[%c1, %c0_30, %c0_31] : memref<8x8x128xf32, #tpu.memory_space<vmem>>, vector<1x8x128xf32>
    %77 = vector.shape_cast %76 : vector<1x8x128xf32> to vector<8x128xf32>
    %78 = arith.truncf %38 : vector<8x32xf32> to vector<8x32xbf16>
    %c0_32 = arith.constant 0 : index
    %c0_33 = arith.constant 0 : index
    %79 = vector.load %arg2[%c0_32, %c0_33] : memref<32x128xbf16, #tpu.memory_space<vmem>>, vector<32x128xbf16>
    %cst_34 = arith.constant dense<0.000000e+00> : vector<8x128xf32>
    %80 = tpu.matmul %78, %79, %cst_34 {dimension_numbers = #tpu.dot_dimension_numbers<[1], [0], [0], [1], [0, 0, 1, 1], [], []>} : vector<8x32xbf16>, vector<32x128xbf16>, vector<8x128xf32> -> vector<8x128xf32>
    %81 = arith.addf %77, %80 : vector<8x128xf32>
    %82 = vector.extract_strided_slice %81 {offsets = [0, 0], sizes = [8, 32], strides = [1, 1]} : vector<8x128xf32> to vector<8x32xf32>
    %83 = arith.negf %82 : vector<8x32xf32>
    %84 = math.exp %83 : vector<8x32xf32>
    %cst_35 = arith.constant 1.000000e+00 : f32
    %85 = vector.broadcast %cst_35 : f32 to vector<8x32xf32>
    %86 = arith.addf %85, %84 : vector<8x32xf32>
    %87 = arith.divf %85, %86 : vector<8x32xf32>
    %88 = vector.extract_strided_slice %81 {offsets = [0, 32], sizes = [8, 32], strides = [1, 1]} : vector<8x128xf32> to vector<8x32xf32>
    %89 = arith.negf %88 : vector<8x32xf32>
    %90 = math.exp %89 : vector<8x32xf32>
    %cst_36 = arith.constant 1.000000e+00 : f32
    %91 = vector.broadcast %cst_36 : f32 to vector<8x32xf32>
    %92 = arith.addf %91, %90 : vector<8x32xf32>
    %93 = arith.divf %91, %92 : vector<8x32xf32>
    %94 = vector.extract_strided_slice %81 {offsets = [0, 64], sizes = [8, 32], strides = [1, 1]} : vector<8x128xf32> to vector<8x32xf32>
    %95 = math.tanh %94 : vector<8x32xf32>
    %96 = vector.extract_strided_slice %81 {offsets = [0, 96], sizes = [8, 32], strides = [1, 1]} : vector<8x128xf32> to vector<8x32xf32>
    %97 = arith.negf %96 : vector<8x32xf32>
    %98 = math.exp %97 : vector<8x32xf32>
    %cst_37 = arith.constant 1.000000e+00 : f32
    %99 = vector.broadcast %cst_37 : f32 to vector<8x32xf32>
    %100 = arith.addf %99, %98 : vector<8x32xf32>
    %101 = arith.divf %99, %100 : vector<8x32xf32>
    %102 = arith.mulf %93, %36 : vector<8x32xf32>
    %103 = arith.mulf %87, %95 : vector<8x32xf32>
    %104 = arith.addf %102, %103 : vector<8x32xf32>
    %105 = math.tanh %104 : vector<8x32xf32>
    %106 = arith.mulf %101, %105 : vector<8x32xf32>
    %107 = arith.truncf %106 : vector<8x32xf32> to vector<8x32xbf16>
    %c0_38 = arith.constant 0 : index
    %c0_39 = arith.constant 0 : index
    %108 = vector.load %arg3[%c0_38, %c0_39] : memref<32x128xbf16, #tpu.memory_space<vmem>>, vector<32x128xbf16>
    %cst_40 = arith.constant dense<0.000000e+00> : vector<8x128xf32>
    %109 = tpu.matmul %107, %108, %cst_40 {dimension_numbers = #tpu.dot_dimension_numbers<[1], [0], [0], [1], [0, 0, 1, 1], [], []>} : vector<8x32xbf16>, vector<32x128xbf16>, vector<8x128xf32> -> vector<8x128xf32>
    %110 = arith.truncf %72 : vector<8x32xf32> to vector<8x32xbf16>
    %c0_41 = arith.constant 0 : index
    %c0_42 = arith.constant 0 : index
    %111 = vector.load %arg4[%c0_41, %c0_42] : memref<32x128xbf16, #tpu.memory_space<vmem>>, vector<32x128xbf16>
    %cst_43 = arith.constant dense<0.000000e+00> : vector<8x128xf32>
    %112 = tpu.matmul %110, %111, %cst_43 {dimension_numbers = #tpu.dot_dimension_numbers<[1], [0], [0], [1], [0, 0, 1, 1], [], []>} : vector<8x32xbf16>, vector<32x128xbf16>, vector<8x128xf32> -> vector<8x128xf32>
    %113 = arith.addf %109, %112 : vector<8x128xf32>
    %114 = vector.broadcast %3 : vector<1x128xf32> to vector<8x128xf32>
    %115 = arith.addf %113, %114 : vector<8x128xf32>
    %116 = vector.extract_strided_slice %115 {offsets = [0, 0], sizes = [8, 32], strides = [1, 1]} : vector<8x128xf32> to vector<8x32xf32>
    %117 = arith.negf %116 : vector<8x32xf32>
    %118 = math.exp %117 : vector<8x32xf32>
    %cst_44 = arith.constant 1.000000e+00 : f32
    %119 = vector.broadcast %cst_44 : f32 to vector<8x32xf32>
    %120 = arith.addf %119, %118 : vector<8x32xf32>
    %121 = arith.divf %119, %120 : vector<8x32xf32>
    %122 = vector.extract_strided_slice %115 {offsets = [0, 32], sizes = [8, 32], strides = [1, 1]} : vector<8x128xf32> to vector<8x32xf32>
    %123 = arith.negf %122 : vector<8x32xf32>
    %124 = math.exp %123 : vector<8x32xf32>
    %cst_45 = arith.constant 1.000000e+00 : f32
    %125 = vector.broadcast %cst_45 : f32 to vector<8x32xf32>
    %126 = arith.addf %125, %124 : vector<8x32xf32>
    %127 = arith.divf %125, %126 : vector<8x32xf32>
    %128 = vector.extract_strided_slice %115 {offsets = [0, 64], sizes = [8, 32], strides = [1, 1]} : vector<8x128xf32> to vector<8x32xf32>
    %129 = math.tanh %128 : vector<8x32xf32>
    %130 = vector.extract_strided_slice %115 {offsets = [0, 96], sizes = [8, 32], strides = [1, 1]} : vector<8x128xf32> to vector<8x32xf32>
    %131 = arith.negf %130 : vector<8x32xf32>
    %132 = math.exp %131 : vector<8x32xf32>
    %cst_46 = arith.constant 1.000000e+00 : f32
    %133 = vector.broadcast %cst_46 : f32 to vector<8x32xf32>
    %134 = arith.addf %133, %132 : vector<8x32xf32>
    %135 = arith.divf %133, %134 : vector<8x32xf32>
    %136 = arith.mulf %127, %70 : vector<8x32xf32>
    %137 = arith.mulf %121, %129 : vector<8x32xf32>
    %138 = arith.addf %136, %137 : vector<8x32xf32>
    %139 = math.tanh %138 : vector<8x32xf32>
    %140 = arith.mulf %135, %139 : vector<8x32xf32>
    %c1_47 = arith.constant 1 : index
    %c0_48 = arith.constant 0 : index
    %c0_49 = arith.constant 0 : index
    %141 = vector.load %arg6[%c1_47, %c0_48, %c0_49] : memref<8x8x32xf32, #tpu.memory_space<vmem>>, vector<1x8x32xf32>
    %142 = vector.shape_cast %141 : vector<1x8x32xf32> to vector<8x32xf32>
    %143 = vector.shape_cast %140 : vector<8x32xf32> to vector<1x8x32xf32>
    tpu.vector_store %arg6[%c1_47, %c0_48, %c0_49], %143 {strides = array<i32>} : memref<8x8x32xf32, #tpu.memory_space<vmem>>, vector<1x8x32xf32>,
    %c2 = arith.constant 2 : index
    %c0_50 = arith.constant 0 : index
    %c0_51 = arith.constant 0 : index
    %144 = vector.load %arg1[%c2, %c0_50, %c0_51] : memref<8x8x128xf32, #tpu.memory_space<vmem>>, vector<1x8x128xf32>
    %145 = vector.shape_cast %144 : vector<1x8x128xf32> to vector<8x128xf32>
    %146 = arith.truncf %106 : vector<8x32xf32> to vector<8x32xbf16>
    %c0_52 = arith.constant 0 : index
    %c0_53 = arith.constant 0 : index
    %147 = vector.load %arg2[%c0_52, %c0_53] : memref<32x128xbf16, #tpu.memory_space<vmem>>, vector<32x128xbf16>
    %cst_54 = arith.constant dense<0.000000e+00> : vector<8x128xf32>
    %148 = tpu.matmul %146, %147, %cst_54 {dimension_numbers = #tpu.dot_dimension_numbers<[1], [0], [0], [1], [0, 0, 1, 1], [], []>} : vector<8x32xbf16>, vector<32x128xbf16>, vector<8x128xf32> -> vector<8x128xf32>
    %149 = arith.addf %145, %148 : vector<8x128xf32>
    %150 = vector.extract_strided_slice %149 {offsets = [0, 0], sizes = [8, 32], strides = [1, 1]} : vector<8x128xf32> to vector<8x32xf32>
    %151 = arith.negf %150 : vector<8x32xf32>
    %152 = math.exp %151 : vector<8x32xf32>
    %cst_55 = arith.constant 1.000000e+00 : f32
    %153 = vector.broadcast %cst_55 : f32 to vector<8x32xf32>
    %154 = arith.addf %153, %152 : vector<8x32xf32>
    %155 = arith.divf %153, %154 : vector<8x32xf32>
    %156 = vector.extract_strided_slice %149 {offsets = [0, 32], sizes = [8, 32], strides = [1, 1]} : vector<8x128xf32> to vector<8x32xf32>
    %157 = arith.negf %156 : vector<8x32xf32>
    %158 = math.exp %157 : vector<8x32xf32>
    %cst_56 = arith.constant 1.000000e+00 : f32
    %159 = vector.broadcast %cst_56 : f32 to vector<8x32xf32>
    %160 = arith.addf %159, %158 : vector<8x32xf32>
    %161 = arith.divf %159, %160 : vector<8x32xf32>
    %162 = vector.extract_strided_slice %149 {offsets = [0, 64], sizes = [8, 32], strides = [1, 1]} : vector<8x128xf32> to vector<8x32xf32>
    %163 = math.tanh %162 : vector<8x32xf32>
    %164 = vector.extract_strided_slice %149 {offsets = [0, 96], sizes = [8, 32], strides = [1, 1]} : vector<8x128xf32> to vector<8x32xf32>
    %165 = arith.negf %164 : vector<8x32xf32>
    %166 = math.exp %165 : vector<8x32xf32>
    %cst_57 = arith.constant 1.000000e+00 : f32
    %167 = vector.broadcast %cst_57 : f32 to vector<8x32xf32>
    %168 = arith.addf %167, %166 : vector<8x32xf32>
    %169 = arith.divf %167, %168 : vector<8x32xf32>
    %170 = arith.mulf %161, %104 : vector<8x32xf32>
    %171 = arith.mulf %155, %163 : vector<8x32xf32>
    %172 = arith.addf %170, %171 : vector<8x32xf32>
    %173 = math.tanh %172 : vector<8x32xf32>
    %174 = arith.mulf %169, %173 : vector<8x32xf32>
    %175 = arith.truncf %174 : vector<8x32xf32> to vector<8x32xbf16>
    %c0_58 = arith.constant 0 : index
    %c0_59 = arith.constant 0 : index
    %176 = vector.load %arg3[%c0_58, %c0_59] : memref<32x128xbf16, #tpu.memory_space<vmem>>, vector<32x128xbf16>
    %cst_60 = arith.constant dense<0.000000e+00> : vector<8x128xf32>
    %177 = tpu.matmul %175, %176, %cst_60 {dimension_numbers = #tpu.dot_dimension_numbers<[1], [0], [0], [1], [0, 0, 1, 1], [], []>} : vector<8x32xbf16>, vector<32x128xbf16>, vector<8x128xf32> -> vector<8x128xf32>
    %178 = arith.truncf %140 : vector<8x32xf32> to vector<8x32xbf16>
    %c0_61 = arith.constant 0 : index
    %c0_62 = arith.constant 0 : index
    %179 = vector.load %arg4[%c0_61, %c0_62] : memref<32x128xbf16, #tpu.memory_space<vmem>>, vector<32x128xbf16>
    %cst_63 = arith.constant dense<0.000000e+00> : vector<8x128xf32>
    %180 = tpu.matmul %178, %179, %cst_63 {dimension_numbers = #tpu.dot_dimension_numbers<[1], [0], [0], [1], [0, 0, 1, 1], [], []>} : vector<8x32xbf16>, vector<32x128xbf16>, vector<8x128xf32> -> vector<8x128xf32>
    %181 = arith.addf %177, %180 : vector<8x128xf32>
    %182 = vector.broadcast %3 : vector<1x128xf32> to vector<8x128xf32>
    %183 = arith.addf %181, %182 : vector<8x128xf32>
    %184 = vector.extract_strided_slice %183 {offsets = [0, 0], sizes = [8, 32], strides = [1, 1]} : vector<8x128xf32> to vector<8x32xf32>
    %185 = arith.negf %184 : vector<8x32xf32>
    %186 = math.exp %185 : vector<8x32xf32>
    %cst_64 = arith.constant 1.000000e+00 : f32
    %187 = vector.broadcast %cst_64 : f32 to vector<8x32xf32>
    %188 = arith.addf %187, %186 : vector<8x32xf32>
    %189 = arith.divf %187, %188 : vector<8x32xf32>
    %190 = vector.extract_strided_slice %183 {offsets = [0, 32], sizes = [8, 32], strides = [1, 1]} : vector<8x128xf32> to vector<8x32xf32>
    %191 = arith.negf %190 : vector<8x32xf32>
    %192 = math.exp %191 : vector<8x32xf32>
    %cst_65 = arith.constant 1.000000e+00 : f32
    %193 = vector.broadcast %cst_65 : f32 to vector<8x32xf32>
    %194 = arith.addf %193, %192 : vector<8x32xf32>
    %195 = arith.divf %193, %194 : vector<8x32xf32>
    %196 = vector.extract_strided_slice %183 {offsets = [0, 64], sizes = [8, 32], strides = [1, 1]} : vector<8x128xf32> to vector<8x32xf32>
    %197 = math.tanh %196 : vector<8x32xf32>
    %198 = vector.extract_strided_slice %183 {offsets = [0, 96], sizes = [8, 32], strides = [1, 1]} : vector<8x128xf32> to vector<8x32xf32>
    %199 = arith.negf %198 : vector<8x32xf32>
    %200 = math.exp %199 : vector<8x32xf32>
    %cst_66 = arith.constant 1.000000e+00 : f32
    %201 = vector.broadcast %cst_66 : f32 to vector<8x32xf32>
    %202 = arith.addf %201, %200 : vector<8x32xf32>
    %203 = arith.divf %201, %202 : vector<8x32xf32>
    %204 = arith.mulf %195, %138 : vector<8x32xf32>
    %205 = arith.mulf %189, %197 : vector<8x32xf32>
    %206 = arith.addf %204, %205 : vector<8x32xf32>
    %207 = math.tanh %206 : vector<8x32xf32>
    %208 = arith.mulf %203, %207 : vector<8x32xf32>
    %c2_67 = arith.constant 2 : index
    %c0_68 = arith.constant 0 : index
    %c0_69 = arith.constant 0 : index
    %209 = vector.load %arg6[%c2_67, %c0_68, %c0_69] : memref<8x8x32xf32, #tpu.memory_space<vmem>>, vector<1x8x32xf32>
    %210 = vector.shape_cast %209 : vector<1x8x32xf32> to vector<8x32xf32>
    %211 = vector.shape_cast %208 : vector<8x32xf32> to vector<1x8x32xf32>
    tpu.vector_store %arg6[%c2_67, %c0_68, %c0_69], %211 {strides = array<i32>} : memref<8x8x32xf32, #tpu.memory_space<vmem>>, vector<1x8x32xf32>,
    %c3 = arith.constant 3 : index
    %c0_70 = arith.constant 0 : index
    %c0_71 = arith.constant 0 : index
    %212 = vector.load %arg1[%c3, %c0_70, %c0_71] : memref<8x8x128xf32, #tpu.memory_space<vmem>>, vector<1x8x128xf32>
    %213 = vector.shape_cast %212 : vector<1x8x128xf32> to vector<8x128xf32>
    %214 = arith.truncf %174 : vector<8x32xf32> to vector<8x32xbf16>
    %c0_72 = arith.constant 0 : index
    %c0_73 = arith.constant 0 : index
    %215 = vector.load %arg2[%c0_72, %c0_73] : memref<32x128xbf16, #tpu.memory_space<vmem>>, vector<32x128xbf16>
    %cst_74 = arith.constant dense<0.000000e+00> : vector<8x128xf32>
    %216 = tpu.matmul %214, %215, %cst_74 {dimension_numbers = #tpu.dot_dimension_numbers<[1], [0], [0], [1], [0, 0, 1, 1], [], []>} : vector<8x32xbf16>, vector<32x128xbf16>, vector<8x128xf32> -> vector<8x128xf32>
    %217 = arith.addf %213, %216 : vector<8x128xf32>
    %218 = vector.extract_strided_slice %217 {offsets = [0, 0], sizes = [8, 32], strides = [1, 1]} : vector<8x128xf32> to vector<8x32xf32>
    %219 = arith.negf %218 : vector<8x32xf32>
    %220 = math.exp %219 : vector<8x32xf32>
    %cst_75 = arith.constant 1.000000e+00 : f32
    %221 = vector.broadcast %cst_75 : f32 to vector<8x32xf32>
    %222 = arith.addf %221, %220 : vector<8x32xf32>
    %223 = arith.divf %221, %222 : vector<8x32xf32>
    %224 = vector.extract_strided_slice %217 {offsets = [0, 32], sizes = [8, 32], strides = [1, 1]} : vector<8x128xf32> to vector<8x32xf32>
    %225 = arith.negf %224 : vector<8x32xf32>
    %226 = math.exp %225 : vector<8x32xf32>
    %cst_76 = arith.constant 1.000000e+00 : f32
    %227 = vector.broadcast %cst_76 : f32 to vector<8x32xf32>
    %228 = arith.addf %227, %226 : vector<8x32xf32>
    %229 = arith.divf %227, %228 : vector<8x32xf32>
    %230 = vector.extract_strided_slice %217 {offsets = [0, 64], sizes = [8, 32], strides = [1, 1]} : vector<8x128xf32> to vector<8x32xf32>
    %231 = math.tanh %230 : vector<8x32xf32>
    %232 = vector.extract_strided_slice %217 {offsets = [0, 96], sizes = [8, 32], strides = [1, 1]} : vector<8x128xf32> to vector<8x32xf32>
    %233 = arith.negf %232 : vector<8x32xf32>
    %234 = math.exp %233 : vector<8x32xf32>
    %cst_77 = arith.constant 1.000000e+00 : f32
    %235 = vector.broadcast %cst_77 : f32 to vector<8x32xf32>
    %236 = arith.addf %235, %234 : vector<8x32xf32>
    %237 = arith.divf %235, %236 : vector<8x32xf32>
    %238 = arith.mulf %229, %172 : vector<8x32xf32>
    %239 = arith.mulf %223, %231 : vector<8x32xf32>
    %240 = arith.addf %238, %239 : vector<8x32xf32>
    %241 = math.tanh %240 : vector<8x32xf32>
    %242 = arith.mulf %237, %241 : vector<8x32xf32>
    %243 = arith.truncf %242 : vector<8x32xf32> to vector<8x32xbf16>
    %c0_78 = arith.constant 0 : index
    %c0_79 = arith.constant 0 : index
    %244 = vector.load %arg3[%c0_78, %c0_79] : memref<32x128xbf16, #tpu.memory_space<vmem>>, vector<32x128xbf16>
    %cst_80 = arith.constant dense<0.000000e+00> : vector<8x128xf32>
    %245 = tpu.matmul %243, %244, %cst_80 {dimension_numbers = #tpu.dot_dimension_numbers<[1], [0], [0], [1], [0, 0, 1, 1], [], []>} : vector<8x32xbf16>, vector<32x128xbf16>, vector<8x128xf32> -> vector<8x128xf32>
    %246 = arith.truncf %208 : vector<8x32xf32> to vector<8x32xbf16>
    %c0_81 = arith.constant 0 : index
    %c0_82 = arith.constant 0 : index
    %247 = vector.load %arg4[%c0_81, %c0_82] : memref<32x128xbf16, #tpu.memory_space<vmem>>, vector<32x128xbf16>
    %cst_83 = arith.constant dense<0.000000e+00> : vector<8x128xf32>
    %248 = tpu.matmul %246, %247, %cst_83 {dimension_numbers = #tpu.dot_dimension_numbers<[1], [0], [0], [1], [0, 0, 1, 1], [], []>} : vector<8x32xbf16>, vector<32x128xbf16>, vector<8x128xf32> -> vector<8x128xf32>
    %249 = arith.addf %245, %248 : vector<8x128xf32>
    %250 = vector.broadcast %3 : vector<1x128xf32> to vector<8x128xf32>
    %251 = arith.addf %249, %250 : vector<8x128xf32>
    %252 = vector.extract_strided_slice %251 {offsets = [0, 0], sizes = [8, 32], strides = [1, 1]} : vector<8x128xf32> to vector<8x32xf32>
    %253 = arith.negf %252 : vector<8x32xf32>
    %254 = math.exp %253 : vector<8x32xf32>
    %cst_84 = arith.constant 1.000000e+00 : f32
    %255 = vector.broadcast %cst_84 : f32 to vector<8x32xf32>
    %256 = arith.addf %255, %254 : vector<8x32xf32>
    %257 = arith.divf %255, %256 : vector<8x32xf32>
    %258 = vector.extract_strided_slice %251 {offsets = [0, 32], sizes = [8, 32], strides = [1, 1]} : vector<8x128xf32> to vector<8x32xf32>
    %259 = arith.negf %258 : vector<8x32xf32>
    %260 = math.exp %259 : vector<8x32xf32>
    %cst_85 = arith.constant 1.000000e+00 : f32
    %261 = vector.broadcast %cst_85 : f32 to vector<8x32xf32>
    %262 = arith.addf %261, %260 : vector<8x32xf32>
    %263 = arith.divf %261, %262 : vector<8x32xf32>
    %264 = vector.extract_strided_slice %251 {offsets = [0, 64], sizes = [8, 32], strides = [1, 1]} : vector<8x128xf32> to vector<8x32xf32>
    %265 = math.tanh %264 : vector<8x32xf32>
    %266 = vector.extract_strided_slice %251 {offsets = [0, 96], sizes = [8, 32], strides = [1, 1]} : vector<8x128xf32> to vector<8x32xf32>
    %267 = arith.negf %266 : vector<8x32xf32>
    %268 = math.exp %267 : vector<8x32xf32>
    %cst_86 = arith.constant 1.000000e+00 : f32
    %269 = vector.broadcast %cst_86 : f32 to vector<8x32xf32>
    %270 = arith.addf %269, %268 : vector<8x32xf32>
    %271 = arith.divf %269, %270 : vector<8x32xf32>
    %272 = arith.mulf %263, %206 : vector<8x32xf32>
    %273 = arith.mulf %257, %265 : vector<8x32xf32>
    %274 = arith.addf %272, %273 : vector<8x32xf32>
    %275 = math.tanh %274 : vector<8x32xf32>
    %276 = arith.mulf %271, %275 : vector<8x32xf32>
    %c3_87 = arith.constant 3 : index
    %c0_88 = arith.constant 0 : index
    %c0_89 = arith.constant 0 : index
    %277 = vector.load %arg6[%c3_87, %c0_88, %c0_89] : memref<8x8x32xf32, #tpu.memory_space<vmem>>, vector<1x8x32xf32>
    %278 = vector.shape_cast %277 : vector<1x8x32xf32> to vector<8x32xf32>
    %279 = vector.shape_cast %276 : vector<8x32xf32> to vector<1x8x32xf32>
    tpu.vector_store %arg6[%c3_87, %c0_88, %c0_89], %279 {strides = array<i32>} : memref<8x8x32xf32, #tpu.memory_space<vmem>>, vector<1x8x32xf32>,
    %c4 = arith.constant 4 : index
    %c0_90 = arith.constant 0 : index
    %c0_91 = arith.constant 0 : index
    %280 = vector.load %arg1[%c4, %c0_90, %c0_91] : memref<8x8x128xf32, #tpu.memory_space<vmem>>, vector<1x8x128xf32>
    %281 = vector.shape_cast %280 : vector<1x8x128xf32> to vector<8x128xf32>
    %282 = arith.truncf %242 : vector<8x32xf32> to vector<8x32xbf16>
    %c0_92 = arith.constant 0 : index
    %c0_93 = arith.constant 0 : index
    %283 = vector.load %arg2[%c0_92, %c0_93] : memref<32x128xbf16, #tpu.memory_space<vmem>>, vector<32x128xbf16>
    %cst_94 = arith.constant dense<0.000000e+00> : vector<8x128xf32>
    %284 = tpu.matmul %282, %283, %cst_94 {dimension_numbers = #tpu.dot_dimension_numbers<[1], [0], [0], [1], [0, 0, 1, 1], [], []>} : vector<8x32xbf16>, vector<32x128xbf16>, vector<8x128xf32> -> vector<8x128xf32>
    %285 = arith.addf %281, %284 : vector<8x128xf32>
    %286 = vector.extract_strided_slice %285 {offsets = [0, 0], sizes = [8, 32], strides = [1, 1]} : vector<8x128xf32> to vector<8x32xf32>
    %287 = arith.negf %286 : vector<8x32xf32>
    %288 = math.exp %287 : vector<8x32xf32>
    %cst_95 = arith.constant 1.000000e+00 : f32
    %289 = vector.broadcast %cst_95 : f32 to vector<8x32xf32>
    %290 = arith.addf %289, %288 : vector<8x32xf32>
    %291 = arith.divf %289, %290 : vector<8x32xf32>
    %292 = vector.extract_strided_slice %285 {offsets = [0, 32], sizes = [8, 32], strides = [1, 1]} : vector<8x128xf32> to vector<8x32xf32>
    %293 = arith.negf %292 : vector<8x32xf32>
    %294 = math.exp %293 : vector<8x32xf32>
    %cst_96 = arith.constant 1.000000e+00 : f32
    %295 = vector.broadcast %cst_96 : f32 to vector<8x32xf32>
    %296 = arith.addf %295, %294 : vector<8x32xf32>
    %297 = arith.divf %295, %296 : vector<8x32xf32>
    %298 = vector.extract_strided_slice %285 {offsets = [0, 64], sizes = [8, 32], strides = [1, 1]} : vector<8x128xf32> to vector<8x32xf32>
    %299 = math.tanh %298 : vector<8x32xf32>
    %300 = vector.extract_strided_slice %285 {offsets = [0, 96], sizes = [8, 32], strides = [1, 1]} : vector<8x128xf32> to vector<8x32xf32>
    %301 = arith.negf %300 : vector<8x32xf32>
    %302 = math.exp %301 : vector<8x32xf32>
    %cst_97 = arith.constant 1.000000e+00 : f32
    %303 = vector.broadcast %cst_97 : f32 to vector<8x32xf32>
    %304 = arith.addf %303, %302 : vector<8x32xf32>
    %305 = arith.divf %303, %304 : vector<8x32xf32>
    %306 = arith.mulf %297, %240 : vector<8x32xf32>
    %307 = arith.mulf %291, %299 : vector<8x32xf32>
    %308 = arith.addf %306, %307 : vector<8x32xf32>
    %309 = math.tanh %308 : vector<8x32xf32>
    %310 = arith.mulf %305, %309 : vector<8x32xf32>
    %311 = arith.truncf %310 : vector<8x32xf32> to vector<8x32xbf16>
    %c0_98 = arith.constant 0 : index
    %c0_99 = arith.constant 0 : index
    %312 = vector.load %arg3[%c0_98, %c0_99] : memref<32x128xbf16, #tpu.memory_space<vmem>>, vector<32x128xbf16>
    %cst_100 = arith.constant dense<0.000000e+00> : vector<8x128xf32>
    %313 = tpu.matmul %311, %312, %cst_100 {dimension_numbers = #tpu.dot_dimension_numbers<[1], [0], [0], [1], [0, 0, 1, 1], [], []>} : vector<8x32xbf16>, vector<32x128xbf16>, vector<8x128xf32> -> vector<8x128xf32>
    %314 = arith.truncf %276 : vector<8x32xf32> to vector<8x32xbf16>
    %c0_101 = arith.constant 0 : index
    %c0_102 = arith.constant 0 : index
    %315 = vector.load %arg4[%c0_101, %c0_102] : memref<32x128xbf16, #tpu.memory_space<vmem>>, vector<32x128xbf16>
    %cst_103 = arith.constant dense<0.000000e+00> : vector<8x128xf32>
    %316 = tpu.matmul %314, %315, %cst_103 {dimension_numbers = #tpu.dot_dimension_numbers<[1], [0], [0], [1], [0, 0, 1, 1], [], []>} : vector<8x32xbf16>, vector<32x128xbf16>, vector<8x128xf32> -> vector<8x128xf32>
    %317 = arith.addf %313, %316 : vector<8x128xf32>
    %318 = vector.broadcast %3 : vector<1x128xf32> to vector<8x128xf32>
    %319 = arith.addf %317, %318 : vector<8x128xf32>
    %320 = vector.extract_strided_slice %319 {offsets = [0, 0], sizes = [8, 32], strides = [1, 1]} : vector<8x128xf32> to vector<8x32xf32>
    %321 = arith.negf %320 : vector<8x32xf32>
    %322 = math.exp %321 : vector<8x32xf32>
    %cst_104 = arith.constant 1.000000e+00 : f32
    %323 = vector.broadcast %cst_104 : f32 to vector<8x32xf32>
    %324 = arith.addf %323, %322 : vector<8x32xf32>
    %325 = arith.divf %323, %324 : vector<8x32xf32>
    %326 = vector.extract_strided_slice %319 {offsets = [0, 32], sizes = [8, 32], strides = [1, 1]} : vector<8x128xf32> to vector<8x32xf32>
    %327 = arith.negf %326 : vector<8x32xf32>
    %328 = math.exp %327 : vector<8x32xf32>
    %cst_105 = arith.constant 1.000000e+00 : f32
    %329 = vector.broadcast %cst_105 : f32 to vector<8x32xf32>
    %330 = arith.addf %329, %328 : vector<8x32xf32>
    %331 = arith.divf %329, %330 : vector<8x32xf32>
    %332 = vector.extract_strided_slice %319 {offsets = [0, 64], sizes = [8, 32], strides = [1, 1]} : vector<8x128xf32> to vector<8x32xf32>
    %333 = math.tanh %332 : vector<8x32xf32>
    %334 = vector.extract_strided_slice %319 {offsets = [0, 96], sizes = [8, 32], strides = [1, 1]} : vector<8x128xf32> to vector<8x32xf32>
    %335 = arith.negf %334 : vector<8x32xf32>
    %336 = math.exp %335 : vector<8x32xf32>
    %cst_106 = arith.constant 1.000000e+00 : f32
    %337 = vector.broadcast %cst_106 : f32 to vector<8x32xf32>
    %338 = arith.addf %337, %336 : vector<8x32xf32>
    %339 = arith.divf %337, %338 : vector<8x32xf32>
    %340 = arith.mulf %331, %274 : vector<8x32xf32>
    %341 = arith.mulf %325, %333 : vector<8x32xf32>
    %342 = arith.addf %340, %341 : vector<8x32xf32>
    %343 = math.tanh %342 : vector<8x32xf32>
    %344 = arith.mulf %339, %343 : vector<8x32xf32>
    %c4_107 = arith.constant 4 : index
    %c0_108 = arith.constant 0 : index
    %c0_109 = arith.constant 0 : index
    %345 = vector.load %arg6[%c4_107, %c0_108, %c0_109] : memref<8x8x32xf32, #tpu.memory_space<vmem>>, vector<1x8x32xf32>
    %346 = vector.shape_cast %345 : vector<1x8x32xf32> to vector<8x32xf32>
    %347 = vector.shape_cast %344 : vector<8x32xf32> to vector<1x8x32xf32>
    tpu.vector_store %arg6[%c4_107, %c0_108, %c0_109], %347 {strides = array<i32>} : memref<8x8x32xf32, #tpu.memory_space<vmem>>, vector<1x8x32xf32>,
    %c5 = arith.constant 5 : index
    %c0_110 = arith.constant 0 : index
    %c0_111 = arith.constant 0 : index
    %348 = vector.load %arg1[%c5, %c0_110, %c0_111] : memref<8x8x128xf32, #tpu.memory_space<vmem>>, vector<1x8x128xf32>
    %349 = vector.shape_cast %348 : vector<1x8x128xf32> to vector<8x128xf32>
    %350 = arith.truncf %310 : vector<8x32xf32> to vector<8x32xbf16>
    %c0_112 = arith.constant 0 : index
    %c0_113 = arith.constant 0 : index
    %351 = vector.load %arg2[%c0_112, %c0_113] : memref<32x128xbf16, #tpu.memory_space<vmem>>, vector<32x128xbf16>
    %cst_114 = arith.constant dense<0.000000e+00> : vector<8x128xf32>
    %352 = tpu.matmul %350, %351, %cst_114 {dimension_numbers = #tpu.dot_dimension_numbers<[1], [0], [0], [1], [0, 0, 1, 1], [], []>} : vector<8x32xbf16>, vector<32x128xbf16>, vector<8x128xf32> -> vector<8x128xf32>
    %353 = arith.addf %349, %352 : vector<8x128xf32>
    %354 = vector.extract_strided_slice %353 {offsets = [0, 0], sizes = [8, 32], strides = [1, 1]} : vector<8x128xf32> to vector<8x32xf32>
    %355 = arith.negf %354 : vector<8x32xf32>
    %356 = math.exp %355 : vector<8x32xf32>
    %cst_115 = arith.constant 1.000000e+00 : f32
    %357 = vector.broadcast %cst_115 : f32 to vector<8x32xf32>
    %358 = arith.addf %357, %356 : vector<8x32xf32>
    %359 = arith.divf %357, %358 : vector<8x32xf32>
    %360 = vector.extract_strided_slice %353 {offsets = [0, 32], sizes = [8, 32], strides = [1, 1]} : vector<8x128xf32> to vector<8x32xf32>
    %361 = arith.negf %360 : vector<8x32xf32>
    %362 = math.exp %361 : vector<8x32xf32>
    %cst_116 = arith.constant 1.000000e+00 : f32
    %363 = vector.broadcast %cst_116 : f32 to vector<8x32xf32>
    %364 = arith.addf %363, %362 : vector<8x32xf32>
    %365 = arith.divf %363, %364 : vector<8x32xf32>
    %366 = vector.extract_strided_slice %353 {offsets = [0, 64], sizes = [8, 32], strides = [1, 1]} : vector<8x128xf32> to vector<8x32xf32>
    %367 = math.tanh %366 : vector<8x32xf32>
    %368 = vector.extract_strided_slice %353 {offsets = [0, 96], sizes = [8, 32], strides = [1, 1]} : vector<8x128xf32> to vector<8x32xf32>
    %369 = arith.negf %368 : vector<8x32xf32>
    %370 = math.exp %369 : vector<8x32xf32>
    %cst_117 = arith.constant 1.000000e+00 : f32
    %371 = vector.broadcast %cst_117 : f32 to vector<8x32xf32>
    %372 = arith.addf %371, %370 : vector<8x32xf32>
    %373 = arith.divf %371, %372 : vector<8x32xf32>
    %374 = arith.mulf %365, %308 : vector<8x32xf32>
    %375 = arith.mulf %359, %367 : vector<8x32xf32>
    %376 = arith.addf %374, %375 : vector<8x32xf32>
    %377 = math.tanh %376 : vector<8x32xf32>
    %378 = arith.mulf %373, %377 : vector<8x32xf32>
    %379 = arith.truncf %378 : vector<8x32xf32> to vector<8x32xbf16>
    %c0_118 = arith.constant 0 : index
    %c0_119 = arith.constant 0 : index
    %380 = vector.load %arg3[%c0_118, %c0_119] : memref<32x128xbf16, #tpu.memory_space<vmem>>, vector<32x128xbf16>
    %cst_120 = arith.constant dense<0.000000e+00> : vector<8x128xf32>
    %381 = tpu.matmul %379, %380, %cst_120 {dimension_numbers = #tpu.dot_dimension_numbers<[1], [0], [0], [1], [0, 0, 1, 1], [], []>} : vector<8x32xbf16>, vector<32x128xbf16>, vector<8x128xf32> -> vector<8x128xf32>
    %382 = arith.truncf %344 : vector<8x32xf32> to vector<8x32xbf16>
    %c0_121 = arith.constant 0 : index
    %c0_122 = arith.constant 0 : index
    %383 = vector.load %arg4[%c0_121, %c0_122] : memref<32x128xbf16, #tpu.memory_space<vmem>>, vector<32x128xbf16>
    %cst_123 = arith.constant dense<0.000000e+00> : vector<8x128xf32>
    %384 = tpu.matmul %382, %383, %cst_123 {dimension_numbers = #tpu.dot_dimension_numbers<[1], [0], [0], [1], [0, 0, 1, 1], [], []>} : vector<8x32xbf16>, vector<32x128xbf16>, vector<8x128xf32> -> vector<8x128xf32>
    %385 = arith.addf %381, %384 : vector<8x128xf32>
    %386 = vector.broadcast %3 : vector<1x128xf32> to vector<8x128xf32>
    %387 = arith.addf %385, %386 : vector<8x128xf32>
    %388 = vector.extract_strided_slice %387 {offsets = [0, 0], sizes = [8, 32], strides = [1, 1]} : vector<8x128xf32> to vector<8x32xf32>
    %389 = arith.negf %388 : vector<8x32xf32>
    %390 = math.exp %389 : vector<8x32xf32>
    %cst_124 = arith.constant 1.000000e+00 : f32
    %391 = vector.broadcast %cst_124 : f32 to vector<8x32xf32>
    %392 = arith.addf %391, %390 : vector<8x32xf32>
    %393 = arith.divf %391, %392 : vector<8x32xf32>
    %394 = vector.extract_strided_slice %387 {offsets = [0, 32], sizes = [8, 32], strides = [1, 1]} : vector<8x128xf32> to vector<8x32xf32>
    %395 = arith.negf %394 : vector<8x32xf32>
    %396 = math.exp %395 : vector<8x32xf32>
    %cst_125 = arith.constant 1.000000e+00 : f32
    %397 = vector.broadcast %cst_125 : f32 to vector<8x32xf32>
    %398 = arith.addf %397, %396 : vector<8x32xf32>
    %399 = arith.divf %397, %398 : vector<8x32xf32>
    %400 = vector.extract_strided_slice %387 {offsets = [0, 64], sizes = [8, 32], strides = [1, 1]} : vector<8x128xf32> to vector<8x32xf32>
    %401 = math.tanh %400 : vector<8x32xf32>
    %402 = vector.extract_strided_slice %387 {offsets = [0, 96], sizes = [8, 32], strides = [1, 1]} : vector<8x128xf32> to vector<8x32xf32>
    %403 = arith.negf %402 : vector<8x32xf32>
    %404 = math.exp %403 : vector<8x32xf32>
    %cst_126 = arith.constant 1.000000e+00 : f32
    %405 = vector.broadcast %cst_126 : f32 to vector<8x32xf32>
    %406 = arith.addf %405, %404 : vector<8x32xf32>
    %407 = arith.divf %405, %406 : vector<8x32xf32>
    %408 = arith.mulf %399, %342 : vector<8x32xf32>
    %409 = arith.mulf %393, %401 : vector<8x32xf32>
    %410 = arith.addf %408, %409 : vector<8x32xf32>
    %411 = math.tanh %410 : vector<8x32xf32>
    %412 = arith.mulf %407, %411 : vector<8x32xf32>
    %c5_127 = arith.constant 5 : index
    %c0_128 = arith.constant 0 : index
    %c0_129 = arith.constant 0 : index
    %413 = vector.load %arg6[%c5_127, %c0_128, %c0_129] : memref<8x8x32xf32, #tpu.memory_space<vmem>>, vector<1x8x32xf32>
    %414 = vector.shape_cast %413 : vector<1x8x32xf32> to vector<8x32xf32>
    %415 = vector.shape_cast %412 : vector<8x32xf32> to vector<1x8x32xf32>
    tpu.vector_store %arg6[%c5_127, %c0_128, %c0_129], %415 {strides = array<i32>} : memref<8x8x32xf32, #tpu.memory_space<vmem>>, vector<1x8x32xf32>,
    %c6 = arith.constant 6 : index
    %c0_130 = arith.constant 0 : index
    %c0_131 = arith.constant 0 : index
    %416 = vector.load %arg1[%c6, %c0_130, %c0_131] : memref<8x8x128xf32, #tpu.memory_space<vmem>>, vector<1x8x128xf32>
    %417 = vector.shape_cast %416 : vector<1x8x128xf32> to vector<8x128xf32>
    %418 = arith.truncf %378 : vector<8x32xf32> to vector<8x32xbf16>
    %c0_132 = arith.constant 0 : index
    %c0_133 = arith.constant 0 : index
    %419 = vector.load %arg2[%c0_132, %c0_133] : memref<32x128xbf16, #tpu.memory_space<vmem>>, vector<32x128xbf16>
    %cst_134 = arith.constant dense<0.000000e+00> : vector<8x128xf32>
    %420 = tpu.matmul %418, %419, %cst_134 {dimension_numbers = #tpu.dot_dimension_numbers<[1], [0], [0], [1], [0, 0, 1, 1], [], []>} : vector<8x32xbf16>, vector<32x128xbf16>, vector<8x128xf32> -> vector<8x128xf32>
    %421 = arith.addf %417, %420 : vector<8x128xf32>
    %422 = vector.extract_strided_slice %421 {offsets = [0, 0], sizes = [8, 32], strides = [1, 1]} : vector<8x128xf32> to vector<8x32xf32>
    %423 = arith.negf %422 : vector<8x32xf32>
    %424 = math.exp %423 : vector<8x32xf32>
    %cst_135 = arith.constant 1.000000e+00 : f32
    %425 = vector.broadcast %cst_135 : f32 to vector<8x32xf32>
    %426 = arith.addf %425, %424 : vector<8x32xf32>
    %427 = arith.divf %425, %426 : vector<8x32xf32>
    %428 = vector.extract_strided_slice %421 {offsets = [0, 32], sizes = [8, 32], strides = [1, 1]} : vector<8x128xf32> to vector<8x32xf32>
    %429 = arith.negf %428 : vector<8x32xf32>
    %430 = math.exp %429 : vector<8x32xf32>
    %cst_136 = arith.constant 1.000000e+00 : f32
    %431 = vector.broadcast %cst_136 : f32 to vector<8x32xf32>
    %432 = arith.addf %431, %430 : vector<8x32xf32>
    %433 = arith.divf %431, %432 : vector<8x32xf32>
    %434 = vector.extract_strided_slice %421 {offsets = [0, 64], sizes = [8, 32], strides = [1, 1]} : vector<8x128xf32> to vector<8x32xf32>
    %435 = math.tanh %434 : vector<8x32xf32>
    %436 = vector.extract_strided_slice %421 {offsets = [0, 96], sizes = [8, 32], strides = [1, 1]} : vector<8x128xf32> to vector<8x32xf32>
    %437 = arith.negf %436 : vector<8x32xf32>
    %438 = math.exp %437 : vector<8x32xf32>
    %cst_137 = arith.constant 1.000000e+00 : f32
    %439 = vector.broadcast %cst_137 : f32 to vector<8x32xf32>
    %440 = arith.addf %439, %438 : vector<8x32xf32>
    %441 = arith.divf %439, %440 : vector<8x32xf32>
    %442 = arith.mulf %433, %376 : vector<8x32xf32>
    %443 = arith.mulf %427, %435 : vector<8x32xf32>
    %444 = arith.addf %442, %443 : vector<8x32xf32>
    %445 = math.tanh %444 : vector<8x32xf32>
    %446 = arith.mulf %441, %445 : vector<8x32xf32>
    %447 = arith.truncf %446 : vector<8x32xf32> to vector<8x32xbf16>
    %c0_138 = arith.constant 0 : index
    %c0_139 = arith.constant 0 : index
    %448 = vector.load %arg3[%c0_138, %c0_139] : memref<32x128xbf16, #tpu.memory_space<vmem>>, vector<32x128xbf16>
    %cst_140 = arith.constant dense<0.000000e+00> : vector<8x128xf32>
    %449 = tpu.matmul %447, %448, %cst_140 {dimension_numbers = #tpu.dot_dimension_numbers<[1], [0], [0], [1], [0, 0, 1, 1], [], []>} : vector<8x32xbf16>, vector<32x128xbf16>, vector<8x128xf32> -> vector<8x128xf32>
    %450 = arith.truncf %412 : vector<8x32xf32> to vector<8x32xbf16>
    %c0_141 = arith.constant 0 : index
    %c0_142 = arith.constant 0 : index
    %451 = vector.load %arg4[%c0_141, %c0_142] : memref<32x128xbf16, #tpu.memory_space<vmem>>, vector<32x128xbf16>
    %cst_143 = arith.constant dense<0.000000e+00> : vector<8x128xf32>
    %452 = tpu.matmul %450, %451, %cst_143 {dimension_numbers = #tpu.dot_dimension_numbers<[1], [0], [0], [1], [0, 0, 1, 1], [], []>} : vector<8x32xbf16>, vector<32x128xbf16>, vector<8x128xf32> -> vector<8x128xf32>
    %453 = arith.addf %449, %452 : vector<8x128xf32>
    %454 = vector.broadcast %3 : vector<1x128xf32> to vector<8x128xf32>
    %455 = arith.addf %453, %454 : vector<8x128xf32>
    %456 = vector.extract_strided_slice %455 {offsets = [0, 0], sizes = [8, 32], strides = [1, 1]} : vector<8x128xf32> to vector<8x32xf32>
    %457 = arith.negf %456 : vector<8x32xf32>
    %458 = math.exp %457 : vector<8x32xf32>
    %cst_144 = arith.constant 1.000000e+00 : f32
    %459 = vector.broadcast %cst_144 : f32 to vector<8x32xf32>
    %460 = arith.addf %459, %458 : vector<8x32xf32>
    %461 = arith.divf %459, %460 : vector<8x32xf32>
    %462 = vector.extract_strided_slice %455 {offsets = [0, 32], sizes = [8, 32], strides = [1, 1]} : vector<8x128xf32> to vector<8x32xf32>
    %463 = arith.negf %462 : vector<8x32xf32>
    %464 = math.exp %463 : vector<8x32xf32>
    %cst_145 = arith.constant 1.000000e+00 : f32
    %465 = vector.broadcast %cst_145 : f32 to vector<8x32xf32>
    %466 = arith.addf %465, %464 : vector<8x32xf32>
    %467 = arith.divf %465, %466 : vector<8x32xf32>
    %468 = vector.extract_strided_slice %455 {offsets = [0, 64], sizes = [8, 32], strides = [1, 1]} : vector<8x128xf32> to vector<8x32xf32>
    %469 = math.tanh %468 : vector<8x32xf32>
    %470 = vector.extract_strided_slice %455 {offsets = [0, 96], sizes = [8, 32], strides = [1, 1]} : vector<8x128xf32> to vector<8x32xf32>
    %471 = arith.negf %470 : vector<8x32xf32>
    %472 = math.exp %471 : vector<8x32xf32>
    %cst_146 = arith.constant 1.000000e+00 : f32
    %473 = vector.broadcast %cst_146 : f32 to vector<8x32xf32>
    %474 = arith.addf %473, %472 : vector<8x32xf32>
    %475 = arith.divf %473, %474 : vector<8x32xf32>
    %476 = arith.mulf %467, %410 : vector<8x32xf32>
    %477 = arith.mulf %461, %469 : vector<8x32xf32>
    %478 = arith.addf %476, %477 : vector<8x32xf32>
    %479 = math.tanh %478 : vector<8x32xf32>
    %480 = arith.mulf %475, %479 : vector<8x32xf32>
    %c6_147 = arith.constant 6 : index
    %c0_148 = arith.constant 0 : index
    %c0_149 = arith.constant 0 : index
    %481 = vector.load %arg6[%c6_147, %c0_148, %c0_149] : memref<8x8x32xf32, #tpu.memory_space<vmem>>, vector<1x8x32xf32>
    %482 = vector.shape_cast %481 : vector<1x8x32xf32> to vector<8x32xf32>
    %483 = vector.shape_cast %480 : vector<8x32xf32> to vector<1x8x32xf32>
    tpu.vector_store %arg6[%c6_147, %c0_148, %c0_149], %483 {strides = array<i32>} : memref<8x8x32xf32, #tpu.memory_space<vmem>>, vector<1x8x32xf32>,
    %c7 = arith.constant 7 : index
    %c0_150 = arith.constant 0 : index
    %c0_151 = arith.constant 0 : index
    %484 = vector.load %arg1[%c7, %c0_150, %c0_151] : memref<8x8x128xf32, #tpu.memory_space<vmem>>, vector<1x8x128xf32>
    %485 = vector.shape_cast %484 : vector<1x8x128xf32> to vector<8x128xf32>
    %486 = arith.truncf %446 : vector<8x32xf32> to vector<8x32xbf16>
    %c0_152 = arith.constant 0 : index
    %c0_153 = arith.constant 0 : index
    %487 = vector.load %arg2[%c0_152, %c0_153] : memref<32x128xbf16, #tpu.memory_space<vmem>>, vector<32x128xbf16>
    %cst_154 = arith.constant dense<0.000000e+00> : vector<8x128xf32>
    %488 = tpu.matmul %486, %487, %cst_154 {dimension_numbers = #tpu.dot_dimension_numbers<[1], [0], [0], [1], [0, 0, 1, 1], [], []>} : vector<8x32xbf16>, vector<32x128xbf16>, vector<8x128xf32> -> vector<8x128xf32>
    %489 = arith.addf %485, %488 : vector<8x128xf32>
    %490 = vector.extract_strided_slice %489 {offsets = [0, 0], sizes = [8, 32], strides = [1, 1]} : vector<8x128xf32> to vector<8x32xf32>
    %491 = arith.negf %490 : vector<8x32xf32>
    %492 = math.exp %491 : vector<8x32xf32>
    %cst_155 = arith.constant 1.000000e+00 : f32
    %493 = vector.broadcast %cst_155 : f32 to vector<8x32xf32>
    %494 = arith.addf %493, %492 : vector<8x32xf32>
    %495 = arith.divf %493, %494 : vector<8x32xf32>
    %496 = vector.extract_strided_slice %489 {offsets = [0, 32], sizes = [8, 32], strides = [1, 1]} : vector<8x128xf32> to vector<8x32xf32>
    %497 = arith.negf %496 : vector<8x32xf32>
    %498 = math.exp %497 : vector<8x32xf32>
    %cst_156 = arith.constant 1.000000e+00 : f32
    %499 = vector.broadcast %cst_156 : f32 to vector<8x32xf32>
    %500 = arith.addf %499, %498 : vector<8x32xf32>
    %501 = arith.divf %499, %500 : vector<8x32xf32>
    %502 = vector.extract_strided_slice %489 {offsets = [0, 64], sizes = [8, 32], strides = [1, 1]} : vector<8x128xf32> to vector<8x32xf32>
    %503 = math.tanh %502 : vector<8x32xf32>
    %504 = vector.extract_strided_slice %489 {offsets = [0, 96], sizes = [8, 32], strides = [1, 1]} : vector<8x128xf32> to vector<8x32xf32>
    %505 = arith.negf %504 : vector<8x32xf32>
    %506 = math.exp %505 : vector<8x32xf32>
    %cst_157 = arith.constant 1.000000e+00 : f32
    %507 = vector.broadcast %cst_157 : f32 to vector<8x32xf32>
    %508 = arith.addf %507, %506 : vector<8x32xf32>
    %509 = arith.divf %507, %508 : vector<8x32xf32>
    %510 = arith.mulf %501, %444 : vector<8x32xf32>
    %511 = arith.mulf %495, %503 : vector<8x32xf32>
    %512 = arith.addf %510, %511 : vector<8x32xf32>
    %513 = math.tanh %512 : vector<8x32xf32>
    %514 = arith.mulf %509, %513 : vector<8x32xf32>
    %515 = arith.truncf %514 : vector<8x32xf32> to vector<8x32xbf16>
    %c0_158 = arith.constant 0 : index
    %c0_159 = arith.constant 0 : index
    %516 = vector.load %arg3[%c0_158, %c0_159] : memref<32x128xbf16, #tpu.memory_space<vmem>>, vector<32x128xbf16>
    %cst_160 = arith.constant dense<0.000000e+00> : vector<8x128xf32>
    %517 = tpu.matmul %515, %516, %cst_160 {dimension_numbers = #tpu.dot_dimension_numbers<[1], [0], [0], [1], [0, 0, 1, 1], [], []>} : vector<8x32xbf16>, vector<32x128xbf16>, vector<8x128xf32> -> vector<8x128xf32>
    %518 = arith.truncf %480 : vector<8x32xf32> to vector<8x32xbf16>
    %c0_161 = arith.constant 0 : index
    %c0_162 = arith.constant 0 : index
    %519 = vector.load %arg4[%c0_161, %c0_162] : memref<32x128xbf16, #tpu.memory_space<vmem>>, vector<32x128xbf16>
    %cst_163 = arith.constant dense<0.000000e+00> : vector<8x128xf32>
    %520 = tpu.matmul %518, %519, %cst_163 {dimension_numbers = #tpu.dot_dimension_numbers<[1], [0], [0], [1], [0, 0, 1, 1], [], []>} : vector<8x32xbf16>, vector<32x128xbf16>, vector<8x128xf32> -> vector<8x128xf32>
    %521 = arith.addf %517, %520 : vector<8x128xf32>
    %522 = vector.broadcast %3 : vector<1x128xf32> to vector<8x128xf32>
    %523 = arith.addf %521, %522 : vector<8x128xf32>
    %524 = vector.extract_strided_slice %523 {offsets = [0, 0], sizes = [8, 32], strides = [1, 1]} : vector<8x128xf32> to vector<8x32xf32>
    %525 = arith.negf %524 : vector<8x32xf32>
    %526 = math.exp %525 : vector<8x32xf32>
    %cst_164 = arith.constant 1.000000e+00 : f32
    %527 = vector.broadcast %cst_164 : f32 to vector<8x32xf32>
    %528 = arith.addf %527, %526 : vector<8x32xf32>
    %529 = arith.divf %527, %528 : vector<8x32xf32>
    %530 = vector.extract_strided_slice %523 {offsets = [0, 32], sizes = [8, 32], strides = [1, 1]} : vector<8x128xf32> to vector<8x32xf32>
    %531 = arith.negf %530 : vector<8x32xf32>
    %532 = math.exp %531 : vector<8x32xf32>
    %cst_165 = arith.constant 1.000000e+00 : f32
    %533 = vector.broadcast %cst_165 : f32 to vector<8x32xf32>
    %534 = arith.addf %533, %532 : vector<8x32xf32>
    %535 = arith.divf %533, %534 : vector<8x32xf32>
    %536 = vector.extract_strided_slice %523 {offsets = [0, 64], sizes = [8, 32], strides = [1, 1]} : vector<8x128xf32> to vector<8x32xf32>
    %537 = math.tanh %536 : vector<8x32xf32>
    %538 = vector.extract_strided_slice %523 {offsets = [0, 96], sizes = [8, 32], strides = [1, 1]} : vector<8x128xf32> to vector<8x32xf32>
    %539 = arith.negf %538 : vector<8x32xf32>
    %540 = math.exp %539 : vector<8x32xf32>
    %cst_166 = arith.constant 1.000000e+00 : f32
    %541 = vector.broadcast %cst_166 : f32 to vector<8x32xf32>
    %542 = arith.addf %541, %540 : vector<8x32xf32>
    %543 = arith.divf %541, %542 : vector<8x32xf32>
    %544 = arith.mulf %535, %478 : vector<8x32xf32>
    %545 = arith.mulf %529, %537 : vector<8x32xf32>
    %546 = arith.addf %544, %545 : vector<8x32xf32>
    %547 = math.tanh %546 : vector<8x32xf32>
    %548 = arith.mulf %543, %547 : vector<8x32xf32>
    %c7_167 = arith.constant 7 : index
    %c0_168 = arith.constant 0 : index
    %c0_169 = arith.constant 0 : index
    %549 = vector.load %arg6[%c7_167, %c0_168, %c0_169] : memref<8x8x32xf32, #tpu.memory_space<vmem>>, vector<1x8x32xf32>
    %550 = vector.shape_cast %549 : vector<1x8x32xf32> to vector<8x32xf32>
    %551 = vector.shape_cast %548 : vector<8x32xf32> to vector<1x8x32xf32>
    tpu.vector_store %arg6[%c7_167, %c0_168, %c0_169], %551 {strides = array<i32>} : memref<8x8x32xf32, #tpu.memory_space<vmem>>, vector<1x8x32xf32>,
    %c0_170 = arith.constant 0 : index
    %c0_171 = arith.constant 0 : index
    %552 = vector.load %arg9[%c0_170, %c0_171] : memref<8x32xf32, #tpu.memory_space<vmem>>, vector<8x32xf32>
    tpu.vector_store %arg9[%c0_170, %c0_171], %514 {strides = array<i32>} : memref<8x32xf32, #tpu.memory_space<vmem>>, vector<8x32xf32>,
    %c0_172 = arith.constant 0 : index
    %c0_173 = arith.constant 0 : index
    %553 = vector.load %arg10[%c0_172, %c0_173] : memref<8x32xf32, #tpu.memory_space<vmem>>, vector<8x32xf32>
    tpu.vector_store %arg10[%c0_172, %c0_173], %512 {strides = array<i32>} : memref<8x32xf32, #tpu.memory_space<vmem>>, vector<8x32xf32>,
    %c0_174 = arith.constant 0 : index
    %c0_175 = arith.constant 0 : index
    %554 = vector.load %arg11[%c0_174, %c0_175] : memref<8x32xf32, #tpu.memory_space<vmem>>, vector<8x32xf32>
    tpu.vector_store %arg11[%c0_174, %c0_175], %548 {strides = array<i32>} : memref<8x32xf32, #tpu.memory_space<vmem>>, vector<8x32xf32>,
    %c0_176 = arith.constant 0 : index
    %c0_177 = arith.constant 0 : index
    %555 = vector.load %arg12[%c0_176, %c0_177] : memref<8x32xf32, #tpu.memory_space<vmem>>, vector<8x32xf32>
    tpu.vector_store %arg12[%c0_176, %c0_177], %546 {strides = array<i32>} : memref<8x32xf32, #tpu.memory_space<vmem>>, vector<8x32xf32>,
    %c0_i32_178 = arith.constant 0 : i32
    %556 = arith.cmpi eq, %arg0, %c0_i32_178 : i32
    %557 = arith.extui %556 : i1 to i32
    %c0_i32_179 = arith.constant 0 : i32
    %558 = arith.cmpi ne, %557, %c0_i32_179 : i32
    scf.if %558 {
      %c0_180 = arith.constant 0 : index
      %c0_181 = arith.constant 0 : index
      %c0_182 = arith.constant 0 : index
      %559 = vector.load %arg7[%c0_180, %c0_181, %c0_182] : memref<2x8x32xf32, #tpu.memory_space<vmem>>, vector<1x8x32xf32>
      %560 = vector.shape_cast %559 : vector<1x8x32xf32> to vector<8x32xf32>
      %561 = vector.shape_cast %514 : vector<8x32xf32> to vector<1x8x32xf32>
      tpu.vector_store %arg7[%c0_180, %c0_181, %c0_182], %561 {strides = array<i32>} : memref<2x8x32xf32, #tpu.memory_space<vmem>>, vector<1x8x32xf32>,
      %c1_183 = arith.constant 1 : index
      %c0_184 = arith.constant 0 : index
      %c0_185 = arith.constant 0 : index
      %562 = vector.load %arg7[%c1_183, %c0_184, %c0_185] : memref<2x8x32xf32, #tpu.memory_space<vmem>>, vector<1x8x32xf32>
      %563 = vector.shape_cast %562 : vector<1x8x32xf32> to vector<8x32xf32>
      %564 = vector.shape_cast %548 : vector<8x32xf32> to vector<1x8x32xf32>
      tpu.vector_store %arg7[%c1_183, %c0_184, %c0_185], %564 {strides = array<i32>} : memref<2x8x32xf32, #tpu.memory_space<vmem>>, vector<1x8x32xf32>,
      %c0_186 = arith.constant 0 : index
      %c0_187 = arith.constant 0 : index
      %c0_188 = arith.constant 0 : index
      %565 = vector.load %arg8[%c0_186, %c0_187, %c0_188] : memref<2x8x32xf32, #tpu.memory_space<vmem>>, vector<1x8x32xf32>
      %566 = vector.shape_cast %565 : vector<1x8x32xf32> to vector<8x32xf32>
      %567 = vector.shape_cast %512 : vector<8x32xf32> to vector<1x8x32xf32>
      tpu.vector_store %arg8[%c0_186, %c0_187, %c0_188], %567 {strides = array<i32>} : memref<2x8x32xf32, #tpu.memory_space<vmem>>, vector<1x8x32xf32>,
      %c1_189 = arith.constant 1 : index
      %c0_190 = arith.constant 0 : index
      %c0_191 = arith.constant 0 : index
      %568 = vector.load %arg8[%c1_189, %c0_190, %c0_191] : memref<2x8x32xf32, #tpu.memory_space<vmem>>, vector<1x8x32xf32>
      %569 = vector.shape_cast %568 : vector<1x8x32xf32> to vector<8x32xf32>
      %570 = vector.shape_cast %546 : vector<8x32xf32> to vector<1x8x32xf32>
      tpu.vector_store %arg8[%c1_189, %c0_190, %c0_191], %570 {strides = array<i32>} : memref<2x8x32xf32, #tpu.memory_space<vmem>>, vector<1x8x32xf32>,
    } else {
    }
    return
  }
  func.func @transform_0(%arg0: i32) -> (i32, i32, i32) {
    %c0_i32 = arith.constant 0 : i32
    %c0_i32_0 = arith.constant 0 : i32
    %c0_i32_1 = arith.constant 0 : i32
    return %arg0, %c0_i32, %c0_i32_0 : i32, i32, i32
  }
  func.func @transform_1(%arg0: i32) -> (i32, i32) {
    %c0_i32 = arith.constant 0 : i32
    %c0_i32_0 = arith.constant 0 : i32
    %c0_i32_1 = arith.constant 0 : i32
    return %c0_i32, %c0_i32_0 : i32, i32
  }
  func.func @transform_2(%arg0: i32) -> (i32, i32) {
    %c0_i32 = arith.constant 0 : i32
    %c0_i32_0 = arith.constant 0 : i32
    %c0_i32_1 = arith.constant 0 : i32
    return %c0_i32, %c0_i32_0 : i32, i32
  }
  func.func @transform_3(%arg0: i32) -> (i32, i32) {
    %c0_i32 = arith.constant 0 : i32
    %c0_i32_0 = arith.constant 0 : i32
    %c0_i32_1 = arith.constant 0 : i32
    return %c0_i32, %c0_i32_0 : i32, i32
  }
  func.func @transform_4(%arg0: i32) -> (i32, i32) {
    %c0_i32 = arith.constant 0 : i32
    %c0_i32_0 = arith.constant 0 : i32
    %c0_i32_1 = arith.constant 0 : i32
    return %c0_i32, %c0_i32_0 : i32, i32
  }
  func.func @transform_5(%arg0: i32) -> (i32, i32, i32) {
    %c0_i32 = arith.constant 0 : i32
    %c0_i32_0 = arith.constant 0 : i32
    %c0_i32_1 = arith.constant 0 : i32
    return %arg0, %c0_i32, %c0_i32_0 : i32, i32, i32
  }
  func.func @transform_6(%arg0: i32) -> (i32, i32, i32) {
    %c0_i32 = arith.constant 0 : i32
    %c0_i32_0 = arith.constant 0 : i32
    %c0_i32_1 = arith.constant 0 : i32
    %c0_i32_2 = arith.constant 0 : i32
    return %c0_i32, %c0_i32_0, %c0_i32_1 : i32, i32, i32
  }
  func.func @transform_7(%arg0: i32) -> (i32, i32, i32) {
    %c0_i32 = arith.constant 0 : i32
    %c0_i32_0 = arith.constant 0 : i32
    %c0_i32_1 = arith.constant 0 : i32
    %c0_i32_2 = arith.constant 0 : i32
    return %c0_i32, %c0_i32_0, %c0_i32_1 : i32, i32, i32
  }
}

</mosaic_0001>

<bundles_post_ra>
// kernel: simple_nlp_forward.3
= control target key start
LH: loop header
LB: loop body
LE: loop exit
PB: predicated region body
PF: predicated region fallthrough
CT: control target
= control target key end

     0   :  { %vm50_vm0 = vcmask 261120   ;;  %s252_s1 = inlined_call_operand.vmem [shape: bf16[32,128], index: 1, kind: input, shape index: {}]   ;;  %s253_s0 = inlined_call_operand.vmem [shape: f32[64,32], index: 0, kind: input, shape index: {}]   ;;  %s254_s2 = inlined_call_operand.vmem [shape: f32[1,128], index: 2, kind: input, shape index: {}]   ;;  %s255_s3 = inlined_call_operand.vmem [shape: f32[64,128], index: 3, kind: output, shape index: {}]  }
   0x1   :  { %v169_v0 = vld [vmem:[%s252_s1 + $0x8] sm:$0xff]   ;;  %v170_v1 = vld [vmem:[%s252_s1] sm:$0xff]   ;;  %v17_v7 = vld [vmem:[%s253_s0 + $0x10] sm:$0xff] }
   0x2   :  { %153 = vmatprep.subr.bf16.mxu0 %v169_v0  ;;  %165 = vmatprep.subr.bf16.mxu1 %v169_v0  ;;  %v15_v2 = vld [vmem:[%s253_s0] sm:$0xff]  ;;  %v16_v3 = vld [vmem:[%s253_s0 + $0x8] sm:$0xff]  ;;  %v18_v8 = vld [vmem:[%s253_s0 + $0x18] sm:$0xff] }
   0x3   :  { %v19_v4 = vld [vmem:[%s253_s0 + $0x20] sm:$0xff]  ;;  %154 = vmatpush3.bf16.msra.mxu0 %v169_v0  ;;  %167 = vmatpush3.bf16.msra.mxu1 %v169_v0  ;;  %v23_v5 = vpack.c.bf16 %v16_v3, %v15_v2  ;;  %v20_v6 = vld [vmem:[%s253_s0 + $0x28] sm:$0xff]  ;;  %v21_v10 = vld [vmem:[%s253_s0 + $0x30] sm:$0xff]  ;;  %v24_v12 = vpack.c.bf16 %v18_v8, %v17_v7 }
   0x4   :  { %155 = vmatprep.subr.bf16.mxu0 %v170_v1  ;;  %166 = vmatprep.subr.bf16.mxu1 %v170_v1  ;;  %v25_v9 = vpack.c.bf16 %v20_v6, %v19_v4  ;;  %v22_v11 = vld [vmem:[%s253_s0 + $0x38] sm:$0xff]  ;;  %v140_v14 = vld [vmem:[%s254_s2] ss:$0 sm:$0xff] }
   0x5   :  { %157 = vmatprep.mubr.msk.bf16.mxu0 %vm50_vm0, %v23_v5  ;;  %v26_v13 = vpack.c.bf16 %v22_v11, %v21_v10 }
   0x6   :  { %161 = vmatprep.mubr.msk.bf16.mxu1 %vm50_vm0, %v25_v9 }
   0x7   :  { %156 = vmatpush3.bf16.msra.mxu0 %v170_v1  ;;  %168 = vmatpush3.bf16.msra.mxu1 %v170_v1 }
   0xa   :  { %158 = vmatmul.mubr.msk.bf16.vlgmr.msra.gmra.mxu0 %vm50_vm0, %v24_v12  ;;  %162 = vmatmul.mubr.msk.bf16.vlgmr.msra.gmra.mxu1 %vm50_vm0, %v26_v13 }
  0xca   :  { %v159_v15 = vpop.f32.mrf.mxu0  ;;  %v163_v16 = vpop.f32.mrf.mxu1 }
  0xcb   :  { %v106_v17 = vadd.f32 %v159_v15, %v140_v14  ;;  %v122_v18 = vadd.f32 %v163_v16, %v140_v14 }
  0xcc   :  { %v97_v19 = vpop.f32.mrf.mxu0  ;;  %v113_v20 = vpop.f32.mrf.mxu1 }
  0xcd   :  { %130 = vst [vmem:[%s255_s3 + $0x10] sm:$0xff] %v106_v17  ;;  %134 = vst [vmem:[%s255_s3 + $0x30] sm:$0xff] %v122_v18  ;;  %v98_v21 = vadd.f32 %v140_v14, %v97_v19  ;;  %v114_v22 = vadd.f32 %v140_v14, %v113_v20 }
  0xce   :  { %v160_v23 = vpop.f32.mrf.mxu0  ;;  %v164_v24 = vpop.f32.mrf.mxu1 }
  0xcf   :  { %128 = vst [vmem:[%s255_s3] sm:$0xff] %v98_v21  ;;  %132 = vst [vmem:[%s255_s3 + $0x20] sm:$0xff] %v114_v22  ;;  %v109_v25 = vadd.f32 %v160_v23, %v140_v14  ;;  %v125_v26 = vadd.f32 %v164_v24, %v140_v14 }
  0xd0   :  { %v100_v27 = vpop.f32.mrf.mxu0  ;;  %v116_v28 = vpop.f32.mrf.mxu1 }
  0xd1   :  { %131 = vst [vmem:[%s255_s3 + $0x18] sm:$0xff] %v109_v25  ;;  %135 = vst [vmem:[%s255_s3 + $0x38] sm:$0xff] %v125_v26  ;;  %v101_v29 = vadd.f32 %v140_v14, %v100_v27  ;;  %v117_v30 = vadd.f32 %v140_v14, %v116_v28 }
  0xd3   :  { %129 = vst [vmem:[%s255_s3 + $0x8] sm:$0xff] %v101_v29  ;;  %133 = vst [vmem:[%s255_s3 + $0x28] sm:$0xff] %v117_v30 }

// kernel: simple_nlp_forward.5
= control target key start
LH: loop header
LB: loop body
LE: loop exit
PB: predicated region body
PF: predicated region fallthrough
CT: control target
= control target key end

     0   :  { %vm51_vm0 = vcmask 261120   ;;  %s272_s0 = inlined_call_operand.vmem [shape: f32[64,32], index: 0, kind: input, shape index: {}]   ;;  %s273_s1 = inlined_call_operand.vmem [shape: bf16[32,128], index: 1, kind: input, shape index: {}]   ;;  %s274_s2 = inlined_call_operand.vmem [shape: f32[1,128], index: 2, kind: input, shape index: {}]   ;;  %s275_s3 = inlined_call_operand.hbm [shape: f32[64,128], index: 3, kind: output, shape index: {}]  }
   0x1   :  { %v185_v0 = vld [vmem:[%s273_s1 + $0x8] sm:$0xff]   ;;  %v186_v1 = vld [vmem:[%s273_s1] sm:$0xff]   ;;  %v18_v7 = vld [vmem:[%s272_s0 + $0x10] sm:$0xff] }
   0x2   :  { %166 = vmatprep.subr.bf16.mxu0 %v185_v0  ;;  %178 = vmatprep.subr.bf16.mxu1 %v185_v0  ;;  %v16_v2 = vld [vmem:[%s272_s0] sm:$0xff]  ;;  %v17_v3 = vld [vmem:[%s272_s0 + $0x8] sm:$0xff]  ;;  %v19_v8 = vld [vmem:[%s272_s0 + $0x18] sm:$0xff] }
   0x3   :  { %v20_v4 = vld [vmem:[%s272_s0 + $0x20] sm:$0xff]  ;;  %167 = vmatpush3.bf16.msra.mxu0 %v185_v0  ;;  %180 = vmatpush3.bf16.msra.mxu1 %v185_v0  ;;  %v24_v5 = vpack.c.bf16 %v17_v3, %v16_v2  ;;  %v21_v6 = vld [vmem:[%s272_s0 + $0x28] sm:$0xff]  ;;  %v22_v10 = vld [vmem:[%s272_s0 + $0x30] sm:$0xff] }
   0x4   :  { %168 = vmatprep.subr.bf16.mxu0 %v186_v1  ;;  %179 = vmatprep.subr.bf16.mxu1 %v186_v1  ;;  %v26_v9 = vpack.c.bf16 %v21_v6, %v20_v4  ;;  %v23_v11 = vld [vmem:[%s272_s0 + $0x38] sm:$0xff] }
   0x5   :  { %8 = vsyncpa [#allocation3], 0  ;;  %170 = vmatprep.mubr.msk.bf16.mxu0 %vm51_vm0, %v24_v5  ;;  %v25_v12 = vpack.c.bf16 %v19_v8, %v18_v7  ;;  %v27_v13 = vpack.c.bf16 %v23_v11, %v22_v10  ;;  %v153_v14 = vld [vmem:[%s274_s2] ss:$0 sm:$0xff]  ;;  %s209_s0 = smov [#allocation2]  }
   0x6   :  { %174 = vmatprep.mubr.msk.bf16.mxu1 %vm51_vm0, %v26_v9  ;;  %s142_s6 = sshll.u32 %s209_s0, 4  ;;  %s143_s6 = int_to_ptr.vmem [resolvable:$true] %s142_s6 }
   0x7   :  { %169 = vmatpush3.bf16.msra.mxu0 %v186_v1  ;;  %181 = vmatpush3.bf16.msra.mxu1 %v186_v1  ;;  %s187_s2 = scalar_lea.vmem %s143_s6, 1024  ;;  %p192_p1 = scmp.lt.s32.totalorder %s143_s6, %s143_s6 }
   0x8   :  { %p188_p0 = scmp.ne.s32.totalorder %s143_s6, %s187_s2  ;;  %p193_p2 = scmp.lt.s32.totalorder %s187_s2, %s187_s2 }
   0xa   :  { %171 = vmatmul.mubr.msk.bf16.vlgmr.msra.gmra.mxu0 %vm51_vm0, %v25_v12  ;;  %175 = vmatmul.mubr.msk.bf16.vlgmr.msra.gmra.mxu1 %vm51_vm0, %v27_v13  ;;  %p194_p3 = por %p193_p2, %p192_p1 }
   0xc   :  { %p195_p4 = pnand %p194_p3, %p188_p0 }
  0xca   :  { %v172_v15 = vpop.f32.mrf.mxu0  ;;  %v176_v16 = vpop.f32.mrf.mxu1 }
  0xcb   :  { %v107_v17 = vadd.f32 %v172_v15, %v153_v14  ;;  %v123_v18 = vadd.f32 %v176_v16, %v153_v14 }
  0xcc   :  { %v98_v19 = vpop.f32.mrf.mxu0  ;;  %v114_v20 = vpop.f32.mrf.mxu1 }
  0xcd   :  { %131 = vst [vmem:[#allocation2 + $0x10] sm:$0xff] %v107_v17  ;;  %135 = vst [vmem:[#allocation2 + $0x30] sm:$0xff] %v123_v18  ;;  %v99_v21 = vadd.f32 %v153_v14, %v98_v19  ;;  %v115_v22 = vadd.f32 %v153_v14, %v114_v20 }
  0xce   :  { %v173_v23 = vpop.f32.mrf.mxu0  ;;  %v177_v24 = vpop.f32.mrf.mxu1 }
  0xcf   :  { %129 = vst [vmem:[#allocation2] sm:$0xff] %v99_v21  ;;  %133 = vst [vmem:[#allocation2 + $0x20] sm:$0xff] %v115_v22  ;;  %v110_v25 = vadd.f32 %v173_v23, %v153_v14  ;;  %v126_v26 = vadd.f32 %v177_v24, %v153_v14 }
  0xd0   :  { %v101_v27 = vpop.f32.mrf.mxu0  ;;  %v117_v28 = vpop.f32.mrf.mxu1 }
  0xd1   :  { %132 = vst [vmem:[#allocation2 + $0x18] sm:$0xff] %v110_v25  ;;  %136 = vst [vmem:[#allocation2 + $0x38] sm:$0xff] %v126_v26  ;;  %v102_v29 = vadd.f32 %v153_v14, %v101_v27  ;;  %v118_v30 = vadd.f32 %v153_v14, %v117_v28 }
  0xd3   :  { %130 = vst [vmem:[#allocation2 + $0x8] sm:$0xff] %v102_v29  ;;  %134 = vst [vmem:[#allocation2 + $0x28] sm:$0xff] %v118_v30 }
  0xd4   :  { %198 = shalt.err (!%p195_p4)
}
  0xd5   :  { %s210_s7 = smov 128   ;;  %s211_s8 = smov 8  }
  0xd6   :  { %148 = dma.vmem_to_hbm [thread:$0]  %s143_s6, 1024, %s275_s3, [#allocation3], %s210_s7, %s210_s7, %s211_s8  }
  0xd7   :  { %207 = dma.done.wait [#allocation3], 1024  }
  0xd8   :  { %208 = vsyncadd [#allocation3], 4294966272 }
  0xd9   :  { %152 = vsyncpa [#allocation3], 1 }

// kernel: simple_nlp_forward.4
= control target key start
LH: loop header
LB: loop body
LE: loop exit
PB: predicated region body
PF: predicated region fallthrough
CT: control target
= control target key end

     0   :  { %13 = vsyncpa [#allocation7], 0  ;;  %v2632_v1 = vmov 0.0   ;;  %vm2633_vm0 = vmmov 0   ;;  %vm30_vm1 = vcmask 261120   ;;  %s3202_s0 = inlined_call_operand.vmem [shape: f32[8,8,128], index: 0, kind: input, shape index: {}]   ;;  %s3203_s1 = inlined_call_operand.vmem [shape: bf16[32,128], index: 1, kind: input, shape index: {}]   ;;  %s3204_s2 = inlined_call_operand.vmem [shape: bf16[32,128], index: 2, kind: input, shape index: {}]   ;;  %s3205_s3 = inlined_call_operand.vmem [shape: bf16[32,128], index: 3, kind: input, shape index: {}]   ;;  %s3206_s4 = inlined_call_operand.vmem [shape: f32[1,128], index: 4, kind: input, shape index: {}]   ;;  %s3207_s5 = inlined_call_operand.vmem [shape: f32[8,8,32], index: 5, kind: output, shape index: {0}]   ;;  %s3208_s6 = inlined_call_operand.hbm [shape: f32[2,8,32], index: 6, kind: output, shape index: {1}]   ;;  %s3209_s7 = inlined_call_operand.hbm [shape: f32[2,8,32], index: 7, kind: output, shape index: {2}]  }
   0x1   :  { %v2411_v0 = vld [vmem:[%s3203_s1 + $0x8] sm:$0xff]   ;;  %2210 = vmatprep.subr.bf16.mxu0 %v2632_v1  ;;  %2218 = vmatprep.subr.bf16.mxu1 %v2632_v1  ;;  %v2412_v2 = vld [vmem:[%s3203_s1] sm:$0xff]   ;;  %31 = vst.msk [vmem:[#allocation2] sm:$0xff] %vm30_vm1, %v2632_v1  ;;  %32 = vst.msk [vmem:[#allocation3] sm:$0xff] %vm30_vm1, %v2632_v1 }
   0x2   :  { %2211 = vmatpush3.bf16.msra.mxu0 %v2411_v0  ;;  %2214 = vmatprep.mubr.msk.bf16.mxu0 %vm2633_vm0, %v2632_v1  ;;  %33 = vst.msk [vmem:[#allocation4] sm:$0xff] %vm30_vm1, %v2632_v1  ;;  %34 = vst.msk [vmem:[#allocation5] sm:$0xff] %vm30_vm1, %v2632_v1 }
   0x3   :  { %2212 = vmatprep.subr.bf16.mxu0 %v2632_v1  ;;  %2222 = vmatprep.mubr.msk.bf16.mxu1 %vm2633_vm0, %v2632_v1 }
   0x6   :  { %2213 = vmatpush3.bf16.msra.mxu0 %v2412_v2 }
   0x7   :  { %2226 = vmatprep.subr.bf16.mxu0 %v2632_v1 }
   0x8   :  { %v36_v3 = vld [vmem:[#allocation2] sm:$0xff] }
   0x9   :  { %v41_v4 = vpack.c.bf16 %v36_v3, %v36_v3 }
   0xb   :  { %2215 = vmatmul.mubr.msk.bf16.vlgmr.msra.gmra.mxu0 %vm30_vm1, %v41_v4 }
   0xc   :  { %2230 = vmatprep.mubr.msk.bf16.mxu0 %vm2633_vm0, %v2632_v1 }
   0xd   :  { %14 = vsyncpa [#allocation9], 0  ;;  %v40_v5 = vld [vmem:[%s3202_s0] sm:$0xff]  ;;  %s2634_s30 = smov 64   ;;  %v37_v12 = vld [vmem:[#allocation3] sm:$0xff]  ;;  %s2635_s8 = smov 32  }
   0xe   :  { %v2413_v23 = vld [vmem:[%s3205_s3 + $0x8] sm:$0xff]   ;;  %v2414_v25 = vld [vmem:[%s3205_s3] sm:$0xff]   ;;  %v38_v26 = vld [vmem:[#allocation4] sm:$0xff]  ;;  %s2637_s16 = smov [#allocation8]  }
   0xf   :  { %v2415_v24 = vld [vmem:[%s3204_s2 + $0x8] sm:$0xff]   ;;  %2219 = vmatpush3.bf16.msra.mxu1 %v2413_v23  ;;  %v2417_v27 = vld [vmem:[%s3204_s2] sm:$0xff]   ;;  %v136_v28 = vpack.c.bf16 %v38_v26, %v38_v26  ;;  %v39_v55 = vld [vmem:[#allocation5] sm:$0xff]  ;;  %s2018_s17 = sshll.u32 %s2637_s16, 4  ;;  %s2019_s17 = int_to_ptr.vmem [resolvable:$true] %s2018_s17 }
  0x10   :  { %2220 = vmatprep.subr.bf16.mxu1 %v2632_v1  ;;  %2227 = vmatpush3.bf16.msra.mxu0 %v2415_v24  ;;  %v2416_v29 = vld [vmem:[%s3203_s1 + $0x8] sm:$0xff]   ;;  %v2418_v31 = vld [vmem:[%s3203_s1] sm:$0xff]   ;;  %p2593_p1 = scmp.lt.s32.totalorder %s2019_s17, %s2019_s17 }
  0x11   :  { %2228 = vmatprep.subr.bf16.mxu0 %v2632_v1  ;;  %v2047_v40 = vld [vmem:[%s3202_s0 + $0x8] sm:$0xff]  ;;  %v2756_v41 = vld [vmem:[%s3206_s4] ss:$0 sm:$0xff] }
  0x13   :  { %2221 = vmatpush3.bf16.msra.mxu1 %v2414_v25  ;;  %v2423_v25 = vld [vmem:[%s3203_s1 + $0x8] sm:$0xff]  }
  0x14   :  { %2234 = vmatprep.subr.bf16.mxu1 %v2632_v1  ;;  %2229 = vmatpush3.bf16.msra.mxu0 %v2417_v27  ;;  %v2424_v27 = vld [vmem:[%s3203_s1] sm:$0xff]  }
  0x15   :  { %2242 = vmatprep.subr.bf16.mxu0 %v2632_v1 }
  0x16   :  { %2223 = vmatmul.mubr.msk.bf16.vlgmr.msra.gmra.mxu1 %vm30_vm1, %v136_v28 }
  0x17   :  { %2235 = vmatpush3.bf16.msra.mxu1 %v2416_v29  ;;  %2238 = vmatprep.mubr.msk.bf16.mxu1 %vm2633_vm0, %v2632_v1 }
  0x18   :  { %2236 = vmatprep.subr.bf16.mxu1 %v2632_v1 }
  0x1b   :  { %2237 = vmatpush3.bf16.msra.mxu1 %v2418_v31 }
  0x1c   :  { %2250 = vmatprep.subr.bf16.mxu1 %v2632_v1 }
  0xcb   :  { %v96_v6 = vpop.f32.mrf.mxu0 }
  0xcc   :  { %v102_v7 = vadd.f32 %v96_v6, %v40_v5 }
  0xcd   :  { %v2216_v8 = vpop.f32.mrf.mxu0 }
  0xce   :  { %2459 = vtanh.f32 %v102_v7  ;;  %v2038_v13 = vmul.f32 -1.442695, %v102_v7 }
  0xcf   :  { %v99_v9 = vpop.f32.mrf.mxu0 }
  0xd0   :  { %2461 = vpow2.f32 %v2038_v13  ;;  %v2420_v13 = vld [vmem:[%s3205_s3 + $0x8] sm:$0xff]  }
  0xd1   :  { %v2217_v10 = vpop.f32.mrf.mxu0 }
  0xd6   :  { %v190_v35 = vpop.f32.mrf.mxu1 }
  0xd8   :  { %v2224_v36 = vpop.f32.mrf.mxu1 }
  0xda   :  { %v193_v37 = vpop.f32.mrf.mxu1 }
  0xdb   :  { %v2460_v11 = vpop.eup %2459 }
  0xdc   :  { %116 = vrot.lane.b32.xlu0 %v2460_v11, %s2634_s30  ;;  %v2225_v38 = vpop.f32.mrf.mxu1 }
  0xdd   :  { %v2462_v14 = vpop.eup %2461  ;;  %v2060_v38 = vld [vmem:[%s3202_s0 + $0x10] sm:$0xff] }
  0xde   :  { %v106_v15 = vadd.f32 1.0, %v2462_v14  ;;  %v2421_v14 = vld [vmem:[%s3204_s2] sm:$0xff]  }
  0xe0   :  { %111 = vrot.lane.b32.xlu0 %v37_v12, %s2635_s8  ;;  %2463 = vrcp.f32 %v106_v15  ;;  %v2419_v12 = vld [vmem:[%s3204_s2 + $0x8] sm:$0xff]   ;;  %v2422_v15 = vld [vmem:[%s3205_s3] sm:$0xff]  }
  0xed   :  { %v2464_v16 = vpop.eup %2463 }
 0x14e   :  { %v117_v17 = vpop.permute.xlu0 %116 }
 0x14f   :  { %v119_v18 = vmul.f32 %v2464_v16, %v117_v17 }
 0x151   :  { %121 = vrot.lane.b32.xlu1 %v119_v18, %s2635_s8 }
 0x152   :  { %v112_v19 = vpop.permute.xlu0 %111 }
 0x153   :  { %v114_v20 = vmul.f32 %v2464_v16, %v112_v19 }
 0x1c3   :  { %v122_v21 = vpop.permute.xlu1 %121 }
 0x1c4   :  { %v2712_v22 = vadd.f32 %v122_v21, %v114_v20 }
 0x1c6   :  { %2465 = vtanh.f32 %v2712_v22 }
 0x1d3   :  { %v2466_v30 = vpop.eup %2465 }
 0x1d4   :  { %127 = vrot.lane.b32.xlu1 %v2466_v30, %s2634_s30 }
 0x246   :  { %v128_v32 = vpop.permute.xlu1 %127 }
 0x247   :  { %v130_v33 = vmul.f32 %v2464_v16, %v128_v32 }
 0x249   :  { %v131_v34 = vpack.c.bf16 %v130_v33, %v130_v33 }
 0x24b   :  { %197 = vrot.lane.b32.xlu0 %v131_v34, %s2635_s8 }
 0x2bd   :  { %v198_v39 = vpop.permute.xlu0 %197 }
 0x2be   :  { %2231 = vmatmul.mubr.msk.bf16.vlgmr.msra.gmra.mxu0 %vm30_vm1, %v198_v39  ;;  %2239 = vmatmul.mubr.msk.bf16.vlgmr.msra.gmra.mxu1 %vm30_vm1, %v198_v39 }
 0x2bf   :  { %2254 = vmatprep.mubr.msk.bf16.mxu1 %vm2633_vm0, %v2632_v1  ;;  %2246 = vmatprep.mubr.msk.bf16.mxu0 %vm2633_vm0, %v2632_v1 }
 0x2c0   :  { %2251 = vmatpush3.bf16.msra.mxu1 %v2419_v12  ;;  %2243 = vmatpush3.bf16.msra.mxu0 %v2420_v13 }
 0x2c1   :  { %2252 = vmatprep.subr.bf16.mxu1 %v2632_v1  ;;  %2244 = vmatprep.subr.bf16.mxu0 %v2632_v1 }
 0x2c4   :  { %2253 = vmatpush3.bf16.msra.mxu1 %v2421_v14  ;;  %2245 = vmatpush3.bf16.msra.mxu0 %v2422_v15  ;;  %v2428_v14 = vld [vmem:[%s3203_s1 + $0x8] sm:$0xff]  }
 0x2c5   :  { %2258 = vmatprep.subr.bf16.mxu0 %v2632_v1  ;;  %2266 = vmatprep.subr.bf16.mxu1 %v2632_v1 }
 0x37e   :  { %v248_v42 = vpop.f32.mrf.mxu0  ;;  %v346_v43 = vpop.f32.mrf.mxu1 }
 0x37f   :  { %v249_v44 = vadd.f32 %v248_v42, %v190_v35  ;;  %v352_v45 = vadd.f32 %v2047_v40, %v346_v43 }
 0x380   :  { %v2232_v46 = vpop.f32.mrf.mxu0  ;;  %v2240_v47 = vpop.f32.mrf.mxu1 }
 0x381   :  { %v260_v48 = vadd.f32 %v2756_v41, %v249_v44  ;;  %2467 = vtanh.f32 %v352_v45  ;;  %v2051_v56 = vmul.f32 -1.442695, %v352_v45 }
 0x382   :  { %v251_v49 = vpop.f32.mrf.mxu0  ;;  %v349_v50 = vpop.f32.mrf.mxu1 }
 0x383   :  { %2469 = vtanh.f32 %v260_v48  ;;  %v2046_v57 = vmul.f32 -1.442695, %v260_v48 }
 0x384   :  { %v2233_v51 = vpop.f32.mrf.mxu0  ;;  %v2241_v52 = vpop.f32.mrf.mxu1  ;;  %2471 = vpow2.f32 %v2051_v56 }
 0x385   :  { %2473 = vpow2.f32 %v2046_v57 }
 0x38e   :  { %v2468_v53 = vpop.eup %2467 }
 0x38f   :  { %362 = vrot.lane.b32.xlu0 %v2468_v53, %s2634_s30 }
 0x390   :  { %v2470_v54 = vpop.eup %2469 }
 0x391   :  { %274 = vrot.lane.b32.xlu1 %v2470_v54, %s2634_s30  ;;  %v2472_v58 = vpop.eup %2471 }
 0x392   :  { %v2474_v59 = vpop.eup %2473  ;;  %v356_v60 = vadd.f32 1.0, %v2472_v58 }
 0x393   :  { %v264_v61 = vadd.f32 1.0, %v2474_v59 }
 0x394   :  { %2475 = vrcp.f32 %v356_v60 }
 0x395   :  { %269 = vrot.lane.b32.xlu1 %v39_v55, %s2635_s8  ;;  %2477 = vrcp.f32 %v264_v61 }
 0x3a1   :  { %v2476_v62 = vpop.eup %2475 }
 0x3a2   :  { %v2478_v2 = vpop.eup %2477  ;;  %v360_v6 = vmul.f32 %v2476_v62, %v2712_v22 }
 0x401   :  { %v363_v63 = vpop.permute.xlu0 %362 }
 0x402   :  { %v365_v0 = vmul.f32 %v2476_v62, %v363_v63 }
 0x403   :  { %v275_v3 = vpop.permute.xlu1 %274 }
 0x404   :  { %v277_v4 = vmul.f32 %v2478_v2, %v275_v3  ;;  %367 = vrot.lane.b32.xlu1 %v365_v0, %s2635_s8  ;;  %v2427_v3 = vld [vmem:[%s3204_s2 + $0x8] sm:$0xff]  }
 0x406   :  { %279 = vrot.lane.b32.xlu0 %v277_v4, %s2635_s8 }
 0x407   :  { %v270_v5 = vpop.permute.xlu1 %269 }
 0x408   :  { %v272_v8 = vmul.f32 %v2478_v2, %v270_v5  ;;  %v2426_v5 = vld [vmem:[%s3205_s3] sm:$0xff]  }
 0x476   :  { %v368_v7 = vpop.permute.xlu1 %367 }
 0x477   :  { %v2765_v9 = vadd.f32 %v368_v7, %v360_v6  ;;  %v2429_v7 = vld [vmem:[%s3204_s2] sm:$0xff]  }
 0x478   :  { %v280_v10 = vpop.permute.xlu0 %279 }
 0x479   :  { %2479 = vtanh.f32 %v2765_v9  ;;  %v2768_v11 = vadd.f32 %v280_v10, %v272_v8 }
 0x47b   :  { %2481 = vtanh.f32 %v2768_v11 }
 0x486   :  { %v2480_v16 = vpop.eup %2479 }
 0x487   :  { %373 = vrot.lane.b32.xlu1 %v2480_v16, %s2634_s30  ;;  %v2430_v16 = vld [vmem:[%s3203_s1] sm:$0xff]  }
 0x488   :  { %v2482_v17 = vpop.eup %2481 }
 0x489   :  { %285 = vrot.lane.b32.xlu0 %v2482_v17, %s2634_s30 }
 0x4f9   :  { %v374_v18 = vpop.permute.xlu1 %373 }
 0x4fa   :  { %v376_v19 = vmul.f32 %v2476_v62, %v374_v18 }
 0x4fb   :  { %v286_v20 = vpop.permute.xlu0 %285 }
 0x4fc   :  { %v377_v21 = vpack.c.bf16 %v376_v19, %v376_v19  ;;  %v2789_v22 = vmul.f32 %v2478_v2, %v286_v20  ;;  %v2425_v2 = vld [vmem:[%s3205_s3 + $0x8] sm:$0xff]  }
 0x4fe   :  { %v382_v23 = vpack.c.bf16 %v2789_v22, %v2789_v22  ;;  %446 = vrot.lane.b32.xlu1 %v377_v21, %s2635_s8 }
 0x500   :  { %388 = vrot.lane.b32.xlu0 %v382_v23, %s2635_s8 }
 0x570   :  { %v447_v24 = vpop.permute.xlu1 %446 }
 0x571   :  { %2255 = vmatmul.mubr.msk.bf16.vlgmr.msra.gmra.mxu1 %vm30_vm1, %v447_v24 }
 0x572   :  { %v389_v26 = vpop.permute.xlu0 %388  ;;  %2270 = vmatprep.mubr.msk.bf16.mxu1 %vm2633_vm0, %v2632_v1  ;;  %2267 = vmatpush3.bf16.msra.mxu1 %v2425_v2 }
 0x573   :  { %2247 = vmatmul.mubr.msk.bf16.vlgmr.msra.gmra.mxu0 %vm30_vm1, %v389_v26  ;;  %2268 = vmatprep.subr.bf16.mxu1 %v2632_v1 }
 0x574   :  { %2259 = vmatpush3.bf16.msra.mxu0 %v2423_v25  ;;  %2262 = vmatprep.mubr.msk.bf16.mxu0 %vm2633_vm0, %v2632_v1 }
 0x575   :  { %2260 = vmatprep.subr.bf16.mxu0 %v2632_v1 }
 0x576   :  { %2269 = vmatpush3.bf16.msra.mxu1 %v2426_v5  ;;  %v2435_v5 = vld [vmem:[%s3203_s1 + $0x8] sm:$0xff]  }
 0x577   :  { %2282 = vmatprep.subr.bf16.mxu1 %v2632_v1 }
 0x578   :  { %2261 = vmatpush3.bf16.msra.mxu0 %v2424_v27 }
 0x579   :  { %2274 = vmatprep.subr.bf16.mxu0 %v2632_v1 }
 0x57b   :  { %2263 = vmatmul.mubr.msk.bf16.vlgmr.msra.gmra.mxu0 %vm30_vm1, %v447_v24  ;;  %v2073_v24 = vld [vmem:[%s3202_s0 + $0x18] sm:$0xff] }
 0x57c   :  { %2278 = vmatprep.mubr.msk.bf16.mxu0 %vm2633_vm0, %v2632_v1  ;;  %2275 = vmatpush3.bf16.msra.mxu0 %v2427_v3 }
 0x57d   :  { %2276 = vmatprep.subr.bf16.mxu0 %v2632_v1 }
 0x580   :  { %2277 = vmatpush3.bf16.msra.mxu0 %v2429_v7 }
 0x581   :  { %2290 = vmatprep.subr.bf16.mxu0 %v2632_v1 }
 0x631   :  { %v497_v28 = vpop.f32.mrf.mxu1 }
 0x633   :  { %v439_v29 = vpop.f32.mrf.mxu0  ;;  %v2256_v30 = vpop.f32.mrf.mxu1 }
 0x634   :  { %v498_v31 = vadd.f32 %v497_v28, %v439_v29 }
 0x635   :  { %v2248_v32 = vpop.f32.mrf.mxu0  ;;  %v500_v33 = vpop.f32.mrf.mxu1 }
 0x636   :  { %v503_v34 = vadd.f32 %v2756_v41, %v498_v31 }
 0x637   :  { %v442_v35 = vpop.f32.mrf.mxu0  ;;  %v2257_v36 = vpop.f32.mrf.mxu1 }
 0x638   :  { %2483 = vtanh.f32 %v503_v34  ;;  %v2058_v47 = vmul.f32 -1.442695, %v503_v34 }
 0x639   :  { %v2249_v37 = vpop.f32.mrf.mxu0 }
 0x63b   :  { %v586_v39 = vpop.f32.mrf.mxu0 }
 0x63c   :  { %v592_v40 = vadd.f32 %v2060_v38, %v586_v39 }
 0x63d   :  { %v2264_v42 = vpop.f32.mrf.mxu0 }
 0x63e   :  { %2485 = vtanh.f32 %v592_v40  ;;  %v2064_v48 = vmul.f32 -1.442695, %v592_v40 }
 0x63f   :  { %v589_v43 = vpop.f32.mrf.mxu0  ;;  %2487 = vpow2.f32 %v2058_v47 }
 0x640   :  { %2489 = vpow2.f32 %v2064_v48 }
 0x641   :  { %v2265_v44 = vpop.f32.mrf.mxu0 }
 0x645   :  { %v2484_v45 = vpop.eup %2483 }
 0x646   :  { %513 = vrot.lane.b32.xlu0 %v2484_v45, %s2634_s30 }
 0x64b   :  { %v2486_v46 = vpop.eup %2485 }
 0x64c   :  { %602 = vrot.lane.b32.xlu1 %v2486_v46, %s2634_s30  ;;  %v2488_v49 = vpop.eup %2487 }
 0x64d   :  { %v507_v50 = vadd.f32 1.0, %v2488_v49  ;;  %v2490_v51 = vpop.eup %2489 }
 0x64e   :  { %v596_v52 = vadd.f32 1.0, %v2490_v51 }
 0x64f   :  { %2491 = vrcp.f32 %v507_v50 }
 0x650   :  { %2493 = vrcp.f32 %v596_v52 }
 0x65c   :  { %v2492_v53 = vpop.eup %2491 }
 0x65d   :  { %v2494_v56 = vpop.eup %2493  ;;  %v511_v59 = vmul.f32 %v2492_v53, %v2768_v11 }
 0x65e   :  { %v600_v62 = vmul.f32 %v2494_v56, %v2765_v9 }
 0x6b8   :  { %v514_v54 = vpop.permute.xlu0 %513 }
 0x6b9   :  { %v516_v55 = vmul.f32 %v2492_v53, %v514_v54 }
 0x6bb   :  { %518 = vrot.lane.b32.xlu0 %v516_v55, %s2635_s8 }
 0x6be   :  { %v603_v57 = vpop.permute.xlu1 %602 }
 0x6bf   :  { %v605_v58 = vmul.f32 %v2494_v56, %v603_v57  ;;  %v2432_v57 = vld [vmem:[%s3204_s2 + $0x8] sm:$0xff]  }
 0x6c1   :  { %607 = vrot.lane.b32.xlu1 %v605_v58, %s2635_s8  ;;  %v2433_v58 = vld [vmem:[%s3205_s3] sm:$0xff]  }
 0x72d   :  { %v519_v60 = vpop.permute.xlu0 %518 }
 0x72e   :  { %v2821_v61 = vadd.f32 %v519_v60, %v511_v59  ;;  %v2434_v59 = vld [vmem:[%s3204_s2] sm:$0xff]  }
 0x730   :  { %2495 = vtanh.f32 %v2821_v61 }
 0x733   :  { %v608_v63 = vpop.permute.xlu1 %607 }
 0x734   :  { %v2825_v0 = vadd.f32 %v608_v63, %v600_v62 }
 0x736   :  { %2497 = vtanh.f32 %v2825_v0 }
 0x73d   :  { %v2496_v4 = vpop.eup %2495 }
 0x73e   :  { %524 = vrot.lane.b32.xlu0 %v2496_v4, %s2634_s30 }
 0x743   :  { %v2498_v6 = vpop.eup %2497 }
 0x744   :  { %613 = vrot.lane.b32.xlu1 %v2498_v6, %s2634_s30 }
 0x7b0   :  { %v525_v8 = vpop.permute.xlu0 %524 }
 0x7b1   :  { %v2846_v9 = vmul.f32 %v2492_v53, %v525_v8  ;;  %v2436_v8 = vld [vmem:[%s3203_s1] sm:$0xff]  }
 0x7b3   :  { %v622_v10 = vpack.c.bf16 %v2846_v9, %v2846_v9 }
 0x7b5   :  { %628 = vrot.lane.b32.xlu0 %v622_v10, %s2635_s8 }
 0x7b6   :  { %v614_v11 = vpop.permute.xlu1 %613 }
 0x7b7   :  { %v616_v12 = vmul.f32 %v2494_v56, %v614_v11  ;;  %v2431_v56 = vld [vmem:[%s3205_s3 + $0x8] sm:$0xff]  }
 0x7b9   :  { %v617_v13 = vpack.c.bf16 %v616_v12, %v616_v12 }
 0x7bb   :  { %686 = vrot.lane.b32.xlu1 %v617_v13, %s2635_s8 }
 0x827   :  { %v629_v15 = vpop.permute.xlu0 %628 }
 0x828   :  { %2271 = vmatmul.mubr.msk.bf16.vlgmr.msra.gmra.mxu1 %vm30_vm1, %v629_v15 }
 0x829   :  { %2283 = vmatpush3.bf16.msra.mxu1 %v2428_v14  ;;  %2286 = vmatprep.mubr.msk.bf16.mxu1 %vm2633_vm0, %v2632_v1 }
 0x82a   :  { %2284 = vmatprep.subr.bf16.mxu1 %v2632_v1 }
 0x82d   :  { %2285 = vmatpush3.bf16.msra.mxu1 %v2430_v16  ;;  %v687_v17 = vpop.permute.xlu1 %686 }
 0x82e   :  { %2279 = vmatmul.mubr.msk.bf16.vlgmr.msra.gmra.mxu0 %vm30_vm1, %v687_v17  ;;  %2298 = vmatprep.subr.bf16.mxu1 %v2632_v1 }
 0x82f   :  { %2294 = vmatprep.mubr.msk.bf16.mxu0 %vm2633_vm0, %v2632_v1  ;;  %2291 = vmatpush3.bf16.msra.mxu0 %v2431_v56 }
 0x830   :  { %2287 = vmatmul.mubr.msk.bf16.vlgmr.msra.gmra.mxu1 %vm30_vm1, %v687_v17  ;;  %2292 = vmatprep.subr.bf16.mxu0 %v2632_v1 }
 0x831   :  { %2302 = vmatprep.mubr.msk.bf16.mxu1 %vm2633_vm0, %v2632_v1  ;;  %2299 = vmatpush3.bf16.msra.mxu1 %v2432_v57 }
 0x832   :  { %2300 = vmatprep.subr.bf16.mxu1 %v2632_v1 }
 0x833   :  { %2293 = vmatpush3.bf16.msra.mxu0 %v2433_v58 }
 0x834   :  { %2306 = vmatprep.subr.bf16.mxu0 %v2632_v1 }
 0x835   :  { %2301 = vmatpush3.bf16.msra.mxu1 %v2434_v59 }
 0x836   :  { %2314 = vmatprep.subr.bf16.mxu1 %v2632_v1 }
 0x8e8   :  { %v679_v18 = vpop.f32.mrf.mxu1 }
 0x8ea   :  { %v2272_v19 = vpop.f32.mrf.mxu1 }
 0x8eb   :  { %v2086_v19 = vld [vmem:[%s3202_s0 + $0x20] sm:$0xff] }
 0x8ec   :  { %v682_v20 = vpop.f32.mrf.mxu1 }
 0x8ee   :  { %v2273_v21 = vpop.f32.mrf.mxu1  ;;  %v737_v23 = vpop.f32.mrf.mxu0 }
 0x8ef   :  { %v738_v25 = vadd.f32 %v737_v23, %v679_v18 }
 0x8f0   :  { %v2280_v26 = vpop.f32.mrf.mxu0  ;;  %v826_v27 = vpop.f32.mrf.mxu1 }
 0x8f1   :  { %v743_v28 = vadd.f32 %v2756_v41, %v738_v25  ;;  %v832_v29 = vadd.f32 %v2073_v24, %v826_v27 }
 0x8f2   :  { %v740_v30 = vpop.f32.mrf.mxu0  ;;  %v2288_v31 = vpop.f32.mrf.mxu1 }
 0x8f3   :  { %2499 = vtanh.f32 %v743_v28  ;;  %v2071_v37 = vmul.f32 -1.442695, %v743_v28  ;;  %v2077_v38 = vmul.f32 -1.442695, %v832_v29 }
 0x8f4   :  { %2501 = vtanh.f32 %v832_v29  ;;  %v2281_v32 = vpop.f32.mrf.mxu0  ;;  %v829_v33 = vpop.f32.mrf.mxu1 }
 0x8f5   :  { %2503 = vpow2.f32 %v2071_v37 }
 0x8f6   :  { %v2289_v34 = vpop.f32.mrf.mxu1  ;;  %2505 = vpow2.f32 %v2077_v38 }
 0x900   :  { %v2500_v35 = vpop.eup %2499 }
 0x901   :  { %v2502_v36 = vpop.eup %2501  ;;  %753 = vrot.lane.b32.xlu0 %v2500_v35, %s2634_s30 }
 0x902   :  { %842 = vrot.lane.b32.xlu1 %v2502_v36, %s2634_s30  ;;  %v2504_v39 = vpop.eup %2503 }
 0x903   :  { %v2506_v40 = vpop.eup %2505  ;;  %v747_v42 = vadd.f32 1.0, %v2504_v39 }
 0x904   :  { %v836_v43 = vadd.f32 1.0, %v2506_v40 }
 0x905   :  { %2507 = vrcp.f32 %v747_v42 }
 0x906   :  { %2509 = vrcp.f32 %v836_v43 }
 0x912   :  { %v2508_v44 = vpop.eup %2507 }
 0x913   :  { %v2510_v46 = vpop.eup %2509  ;;  %v751_v50 = vmul.f32 %v2508_v44, %v2821_v61 }
 0x914   :  { %v840_v51 = vmul.f32 %v2510_v46, %v2825_v0 }
 0x973   :  { %v754_v45 = vpop.permute.xlu0 %753 }
 0x974   :  { %v843_v47 = vpop.permute.xlu1 %842  ;;  %v756_v48 = vmul.f32 %v2508_v44, %v754_v45 }
 0x975   :  { %v845_v49 = vmul.f32 %v2510_v46, %v843_v47 }
 0x976   :  { %758 = vrot.lane.b32.xlu0 %v756_v48, %s2635_s8  ;;  %v2437_v48 = vld [vmem:[%s3205_s3 + $0x8] sm:$0xff]  }
 0x977   :  { %847 = vrot.lane.b32.xlu1 %v845_v49, %s2635_s8  ;;  %v2439_v49 = vld [vmem:[%s3204_s2 + $0x8] sm:$0xff]  }
 0x9e8   :  { %v759_v52 = vpop.permute.xlu0 %758 }
 0x9e9   :  { %v848_v53 = vpop.permute.xlu1 %847  ;;  %v2879_v54 = vadd.f32 %v759_v52, %v751_v50  ;;  %v2438_v50 = vld [vmem:[%s3205_s3] sm:$0xff]  }
 0x9ea   :  { %v2881_v55 = vadd.f32 %v848_v53, %v840_v51  ;;  %v2441_v53 = vld [vmem:[%s3204_s2] sm:$0xff]  }
 0x9eb   :  { %2511 = vtanh.f32 %v2879_v54 }
 0x9ec   :  { %2513 = vtanh.f32 %v2881_v55 }
 0x9f8   :  { %v2512_v60 = vpop.eup %2511 }
 0x9f9   :  { %v2514_v61 = vpop.eup %2513  ;;  %764 = vrot.lane.b32.xlu0 %v2512_v60, %s2634_s30  ;;  %v2440_v60 = vld [vmem:[%s3203_s1 + $0x8] sm:$0xff]  }
 0x9fa   :  { %853 = vrot.lane.b32.xlu1 %v2514_v61, %s2634_s30 }
 0xa6b   :  { %v765_v62 = vpop.permute.xlu0 %764 }
 0xa6c   :  { %v854_v63 = vpop.permute.xlu1 %853  ;;  %v2903_v0 = vmul.f32 %v2508_v44, %v765_v62  ;;  %v2442_v62 = vld [vmem:[%s3203_s1] sm:$0xff]  }
 0xa6d   :  { %v856_v2 = vmul.f32 %v2510_v46, %v854_v63 }
 0xa6e   :  { %v862_v3 = vpack.c.bf16 %v2903_v0, %v2903_v0 }
 0xa6f   :  { %v857_v4 = vpack.c.bf16 %v856_v2, %v856_v2 }
 0xa70   :  { %868 = vrot.lane.b32.xlu0 %v862_v3, %s2635_s8 }
 0xa71   :  { %926 = vrot.lane.b32.xlu1 %v857_v4, %s2635_s8 }
 0xae2   :  { %v869_v6 = vpop.permute.xlu0 %868 }
 0xae3   :  { %v927_v7 = vpop.permute.xlu1 %926  ;;  %2295 = vmatmul.mubr.msk.bf16.vlgmr.msra.gmra.mxu0 %vm30_vm1, %v869_v6 }
 0xae4   :  { %2303 = vmatmul.mubr.msk.bf16.vlgmr.msra.gmra.mxu1 %vm30_vm1, %v927_v7  ;;  %2307 = vmatpush3.bf16.msra.mxu0 %v2435_v5 }
 0xae5   :  { %2308 = vmatprep.subr.bf16.mxu0 %v2632_v1  ;;  %2310 = vmatprep.mubr.msk.bf16.mxu0 %vm2633_vm0, %v2632_v1 }
 0xae6   :  { %2318 = vmatprep.mubr.msk.bf16.mxu1 %vm2633_vm0, %v2632_v1  ;;  %2315 = vmatpush3.bf16.msra.mxu1 %v2437_v48 }
 0xae7   :  { %2316 = vmatprep.subr.bf16.mxu1 %v2632_v1 }
 0xae8   :  { %2309 = vmatpush3.bf16.msra.mxu0 %v2436_v8  ;;  %v2099_v8 = vld [vmem:[%s3202_s0 + $0x28] sm:$0xff] }
 0xae9   :  { %2322 = vmatprep.subr.bf16.mxu0 %v2632_v1 }
 0xaea   :  { %2317 = vmatpush3.bf16.msra.mxu1 %v2438_v50 }
 0xaeb   :  { %2311 = vmatmul.mubr.msk.bf16.vlgmr.msra.gmra.mxu0 %vm30_vm1, %v927_v7  ;;  %2330 = vmatprep.subr.bf16.mxu1 %v2632_v1 }
 0xaec   :  { %2326 = vmatprep.mubr.msk.bf16.mxu0 %vm2633_vm0, %v2632_v1  ;;  %2323 = vmatpush3.bf16.msra.mxu0 %v2439_v49 }
 0xaed   :  { %2324 = vmatprep.subr.bf16.mxu0 %v2632_v1 }
 0xaf0   :  { %2325 = vmatpush3.bf16.msra.mxu0 %v2441_v53  ;;  %v2447_v53 = vld [vmem:[%s3203_s1 + $0x8] sm:$0xff]  }
 0xaf1   :  { %2338 = vmatprep.subr.bf16.mxu0 %v2632_v1 }
 0xba3   :  { %v919_v10 = vpop.f32.mrf.mxu0 }
 0xba4   :  { %v977_v11 = vpop.f32.mrf.mxu1 }
 0xba5   :  { %v978_v12 = vadd.f32 %v977_v11, %v919_v10  ;;  %v2296_v13 = vpop.f32.mrf.mxu0 }
 0xba6   :  { %v2304_v14 = vpop.f32.mrf.mxu1 }
 0xba7   :  { %v983_v15 = vadd.f32 %v2756_v41, %v978_v12  ;;  %v922_v16 = vpop.f32.mrf.mxu0 }
 0xba8   :  { %v980_v17 = vpop.f32.mrf.mxu1 }
 0xba9   :  { %2515 = vtanh.f32 %v983_v15  ;;  %v2297_v18 = vpop.f32.mrf.mxu0  ;;  %v2084_v29 = vmul.f32 -1.442695, %v983_v15 }
 0xbaa   :  { %v2305_v20 = vpop.f32.mrf.mxu1 }
 0xbab   :  { %v1066_v21 = vpop.f32.mrf.mxu0 }
 0xbac   :  { %v1072_v23 = vadd.f32 %v2086_v19, %v1066_v21 }
 0xbad   :  { %v2312_v24 = vpop.f32.mrf.mxu0 }
 0xbae   :  { %2517 = vtanh.f32 %v1072_v23  ;;  %v2090_v30 = vmul.f32 -1.442695, %v1072_v23 }
 0xbaf   :  { %v1069_v25 = vpop.f32.mrf.mxu0  ;;  %2519 = vpow2.f32 %v2084_v29 }
 0xbb0   :  { %2521 = vpow2.f32 %v2090_v30 }
 0xbb1   :  { %v2313_v26 = vpop.f32.mrf.mxu0 }
 0xbb6   :  { %v2516_v27 = vpop.eup %2515 }
 0xbb7   :  { %993 = vrot.lane.b32.xlu0 %v2516_v27, %s2634_s30 }
 0xbbb   :  { %v2518_v28 = vpop.eup %2517 }
 0xbbc   :  { %1082 = vrot.lane.b32.xlu1 %v2518_v28, %s2634_s30  ;;  %v2520_v31 = vpop.eup %2519 }
 0xbbd   :  { %v987_v32 = vadd.f32 1.0, %v2520_v31  ;;  %v2522_v33 = vpop.eup %2521 }
 0xbbe   :  { %v1076_v34 = vadd.f32 1.0, %v2522_v33 }
 0xbbf   :  { %2523 = vrcp.f32 %v987_v32 }
 0xbc0   :  { %2525 = vrcp.f32 %v1076_v34 }
 0xbcc   :  { %v2524_v35 = vpop.eup %2523 }
 0xbcd   :  { %v2526_v38 = vpop.eup %2525  ;;  %v991_v42 = vmul.f32 %v2524_v35, %v2879_v54 }
 0xbce   :  { %v1080_v45 = vmul.f32 %v2526_v38, %v2881_v55 }
 0xc29   :  { %v994_v36 = vpop.permute.xlu0 %993 }
 0xc2a   :  { %v996_v37 = vmul.f32 %v2524_v35, %v994_v36 }
 0xc2c   :  { %998 = vrot.lane.b32.xlu0 %v996_v37, %s2635_s8 }
 0xc2e   :  { %v1083_v39 = vpop.permute.xlu1 %1082 }
 0xc2f   :  { %v1085_v40 = vmul.f32 %v2526_v38, %v1083_v39 }
 0xc31   :  { %1087 = vrot.lane.b32.xlu1 %v1085_v40, %s2635_s8  ;;  %v2443_v40 = vld [vmem:[%s3205_s3 + $0x8] sm:$0xff]  }
 0xc9e   :  { %v999_v43 = vpop.permute.xlu0 %998 }
 0xc9f   :  { %v2935_v44 = vadd.f32 %v999_v43, %v991_v42  ;;  %v2444_v42 = vld [vmem:[%s3204_s2 + $0x8] sm:$0xff]   ;;  %v2445_v43 = vld [vmem:[%s3205_s3] sm:$0xff]  }
 0xca1   :  { %2527 = vtanh.f32 %v2935_v44 }
 0xca3   :  { %v1088_v46 = vpop.permute.xlu1 %1087 }
 0xca4   :  { %v2939_v47 = vadd.f32 %v1088_v46, %v1080_v45 }
 0xca6   :  { %2529 = vtanh.f32 %v2939_v47 }
 0xcae   :  { %v2528_v51 = vpop.eup %2527 }
 0xcaf   :  { %1004 = vrot.lane.b32.xlu0 %v2528_v51, %s2634_s30 }
 0xcb3   :  { %v2530_v52 = vpop.eup %2529 }
 0xcb4   :  { %1093 = vrot.lane.b32.xlu1 %v2530_v52, %s2634_s30 }
 0xd21   :  { %v1005_v54 = vpop.permute.xlu0 %1004 }
 0xd22   :  { %v2960_v55 = vmul.f32 %v2524_v35, %v1005_v54 }
 0xd24   :  { %v1102_v56 = vpack.c.bf16 %v2960_v55, %v2960_v55 }
 0xd26   :  { %1108 = vrot.lane.b32.xlu0 %v1102_v56, %s2635_s8  ;;  %v1094_v57 = vpop.permute.xlu1 %1093 }
 0xd27   :  { %v1096_v58 = vmul.f32 %v2526_v38, %v1094_v57  ;;  %v2448_v57 = vld [vmem:[%s3203_s1] sm:$0xff]  }
 0xd29   :  { %v1097_v59 = vpack.c.bf16 %v1096_v58, %v1096_v58 }
 0xd2b   :  { %1166 = vrot.lane.b32.xlu1 %v1097_v59, %s2635_s8 }
 0xd98   :  { %v1109_v61 = vpop.permute.xlu0 %1108 }
 0xd99   :  { %2319 = vmatmul.mubr.msk.bf16.vlgmr.msra.gmra.mxu1 %vm30_vm1, %v1109_v61 }
 0xd9a   :  { %2331 = vmatpush3.bf16.msra.mxu1 %v2440_v60  ;;  %2334 = vmatprep.mubr.msk.bf16.mxu1 %vm2633_vm0, %v2632_v1 }
 0xd9b   :  { %2332 = vmatprep.subr.bf16.mxu1 %v2632_v1 }
 0xd9d   :  { %v1167_v63 = vpop.permute.xlu1 %1166 }
 0xd9e   :  { %2333 = vmatpush3.bf16.msra.mxu1 %v2442_v62  ;;  %2327 = vmatmul.mubr.msk.bf16.vlgmr.msra.gmra.mxu0 %vm30_vm1, %v1167_v63 }
 0xd9f   :  { %2346 = vmatprep.subr.bf16.mxu1 %v2632_v1  ;;  %2342 = vmatprep.mubr.msk.bf16.mxu0 %vm2633_vm0, %v2632_v1 }
 0xda0   :  { %2339 = vmatpush3.bf16.msra.mxu0 %v2443_v40 }
 0xda1   :  { %2335 = vmatmul.mubr.msk.bf16.vlgmr.msra.gmra.mxu1 %vm30_vm1, %v1167_v63  ;;  %2340 = vmatprep.subr.bf16.mxu0 %v2632_v1 }
 0xda2   :  { %2350 = vmatprep.mubr.msk.bf16.mxu1 %vm2633_vm0, %v2632_v1  ;;  %2347 = vmatpush3.bf16.msra.mxu1 %v2444_v42 }
 0xda3   :  { %2348 = vmatprep.subr.bf16.mxu1 %v2632_v1 }
 0xda4   :  { %2341 = vmatpush3.bf16.msra.mxu0 %v2445_v43 }
 0xda5   :  { %2354 = vmatprep.subr.bf16.mxu0 %v2632_v1 }
 0xe59   :  { %v1159_v2 = vpop.f32.mrf.mxu1 }
 0xe5b   :  { %v2320_v3 = vpop.f32.mrf.mxu1 }
 0xe5d   :  { %v1162_v4 = vpop.f32.mrf.mxu1 }
 0xe5e   :  { %v1217_v5 = vpop.f32.mrf.mxu0 }
 0xe5f   :  { %v2321_v6 = vpop.f32.mrf.mxu1  ;;  %v1218_v7 = vadd.f32 %v1217_v5, %v1159_v2  ;;  %v2112_v5 = vld [vmem:[%s3202_s0 + $0x30] sm:$0xff] }
 0xe60   :  { %v2328_v10 = vpop.f32.mrf.mxu0 }
 0xe61   :  { %v1223_v11 = vadd.f32 %v2756_v41, %v1218_v7  ;;  %v1306_v12 = vpop.f32.mrf.mxu1 }
 0xe62   :  { %v1312_v13 = vadd.f32 %v2099_v8, %v1306_v12  ;;  %v1220_v14 = vpop.f32.mrf.mxu0 }
 0xe63   :  { %2531 = vtanh.f32 %v1223_v11  ;;  %v2336_v15 = vpop.f32.mrf.mxu1  ;;  %v2097_v21 = vmul.f32 -1.442695, %v1223_v11 }
 0xe64   :  { %2533 = vtanh.f32 %v1312_v13  ;;  %v2329_v16 = vpop.f32.mrf.mxu0  ;;  %v2103_v23 = vmul.f32 -1.442695, %v1312_v13 }
 0xe65   :  { %v1309_v17 = vpop.f32.mrf.mxu1  ;;  %2535 = vpow2.f32 %v2097_v21 }
 0xe66   :  { %2537 = vpow2.f32 %v2103_v23 }
 0xe67   :  { %v2337_v18 = vpop.f32.mrf.mxu1 }
 0xe70   :  { %v2532_v19 = vpop.eup %2531 }
 0xe71   :  { %v2534_v20 = vpop.eup %2533  ;;  %1233 = vrot.lane.b32.xlu0 %v2532_v19, %s2634_s30 }
 0xe72   :  { %1322 = vrot.lane.b32.xlu1 %v2534_v20, %s2634_s30  ;;  %v2536_v24 = vpop.eup %2535 }
 0xe73   :  { %v2538_v25 = vpop.eup %2537  ;;  %v1227_v26 = vadd.f32 1.0, %v2536_v24 }
 0xe74   :  { %v1316_v27 = vadd.f32 1.0, %v2538_v25 }
 0xe75   :  { %2539 = vrcp.f32 %v1227_v26 }
 0xe76   :  { %2541 = vrcp.f32 %v1316_v27 }
 0xe82   :  { %v2540_v28 = vpop.eup %2539 }
 0xe83   :  { %v2542_v30 = vpop.eup %2541  ;;  %v1231_v34 = vmul.f32 %v2540_v28, %v2935_v44  ;;  %v2446_v44 = vld [vmem:[%s3204_s2] sm:$0xff]  }
 0xe84   :  { %v1320_v35 = vmul.f32 %v2542_v30, %v2939_v47  ;;  %2349 = vmatpush3.bf16.msra.mxu1 %v2446_v44 }
 0xe85   :  { %2362 = vmatprep.subr.bf16.mxu1 %v2632_v1 }
 0xee3   :  { %v1234_v29 = vpop.permute.xlu0 %1233 }
 0xee4   :  { %v1323_v31 = vpop.permute.xlu1 %1322  ;;  %v1236_v32 = vmul.f32 %v2540_v28, %v1234_v29 }
 0xee5   :  { %v1325_v33 = vmul.f32 %v2542_v30, %v1323_v31 }
 0xee6   :  { %1238 = vrot.lane.b32.xlu0 %v1236_v32, %s2635_s8 }
 0xee7   :  { %1327 = vrot.lane.b32.xlu1 %v1325_v33, %s2635_s8  ;;  %v2449_v33 = vld [vmem:[%s3205_s3 + $0x8] sm:$0xff]  }
 0xf58   :  { %v1239_v36 = vpop.permute.xlu0 %1238 }
 0xf59   :  { %v1328_v37 = vpop.permute.xlu1 %1327  ;;  %v2993_v38 = vadd.f32 %v1239_v36, %v1231_v34  ;;  %v2451_v34 = vld [vmem:[%s3204_s2 + $0x8] sm:$0xff]  }
 0xf5a   :  { %v2995_v39 = vadd.f32 %v1328_v37, %v1320_v35  ;;  %v2450_v35 = vld [vmem:[%s3205_s3] sm:$0xff]  }
 0xf5b   :  { %2543 = vtanh.f32 %v2993_v38 }
 0xf5c   :  { %2545 = vtanh.f32 %v2995_v39 }
 0xf68   :  { %v2544_v45 = vpop.eup %2543 }
 0xf69   :  { %v2546_v46 = vpop.eup %2545  ;;  %1244 = vrot.lane.b32.xlu0 %v2544_v45, %s2634_s30 }
 0xf6a   :  { %1333 = vrot.lane.b32.xlu1 %v2546_v46, %s2634_s30  ;;  %v2452_v46 = vld [vmem:[%s3203_s1 + $0x8] sm:$0xff]  }
 0xfdb   :  { %v1245_v47 = vpop.permute.xlu0 %1244 }
 0xfdc   :  { %v1334_v48 = vpop.permute.xlu1 %1333  ;;  %v3017_v49 = vmul.f32 %v2540_v28, %v1245_v47 }
 0xfdd   :  { %v1336_v50 = vmul.f32 %v2542_v30, %v1334_v48  ;;  %v2454_v48 = vld [vmem:[%s3203_s1] sm:$0xff]  }
 0xfde   :  { %v1342_v51 = vpack.c.bf16 %v3017_v49, %v3017_v49 }
 0xfdf   :  { %v1337_v52 = vpack.c.bf16 %v1336_v50, %v1336_v50 }
 0xfe0   :  { %1348 = vrot.lane.b32.xlu0 %v1342_v51, %s2635_s8 }
 0xfe1   :  { %1406 = vrot.lane.b32.xlu1 %v1337_v52, %s2635_s8 }
0x1052   :  { %v1349_v54 = vpop.permute.xlu0 %1348 }
0x1053   :  { %v1407_v56 = vpop.permute.xlu1 %1406  ;;  %2343 = vmatmul.mubr.msk.bf16.vlgmr.msra.gmra.mxu0 %vm30_vm1, %v1349_v54 }
0x1054   :  { %2351 = vmatmul.mubr.msk.bf16.vlgmr.msra.gmra.mxu1 %vm30_vm1, %v1407_v56  ;;  %2355 = vmatpush3.bf16.msra.mxu0 %v2447_v53 }
0x1055   :  { %2356 = vmatprep.subr.bf16.mxu0 %v2632_v1  ;;  %2358 = vmatprep.mubr.msk.bf16.mxu0 %vm2633_vm0, %v2632_v1 }
0x1056   :  { %2366 = vmatprep.mubr.msk.bf16.mxu1 %vm2633_vm0, %v2632_v1  ;;  %2363 = vmatpush3.bf16.msra.mxu1 %v2449_v33 }
0x1057   :  { %2364 = vmatprep.subr.bf16.mxu1 %v2632_v1 }
0x1058   :  { %2357 = vmatpush3.bf16.msra.mxu0 %v2448_v57 }
0x1059   :  { %2370 = vmatprep.subr.bf16.mxu0 %v2632_v1 }
0x105a   :  { %2365 = vmatpush3.bf16.msra.mxu1 %v2450_v35 }
0x105b   :  { %2359 = vmatmul.mubr.msk.bf16.vlgmr.msra.gmra.mxu0 %vm30_vm1, %v1407_v56  ;;  %2378 = vmatprep.subr.bf16.mxu1 %v2632_v1 }
0x105c   :  { %2374 = vmatprep.mubr.msk.bf16.mxu0 %vm2633_vm0, %v2632_v1  ;;  %2371 = vmatpush3.bf16.msra.mxu0 %v2451_v34 }
0x105d   :  { %2372 = vmatprep.subr.bf16.mxu0 %v2632_v1 }
0x1113   :  { %v1399_v58 = vpop.f32.mrf.mxu0 }
0x1114   :  { %v1457_v59 = vpop.f32.mrf.mxu1 }
0x1115   :  { %v1458_v60 = vadd.f32 %v1457_v59, %v1399_v58  ;;  %v2344_v61 = vpop.f32.mrf.mxu0  ;;  %v2125_v58 = vld [vmem:[%s3202_s0 + $0x38] sm:$0xff] }
0x1116   :  { %v2352_v62 = vpop.f32.mrf.mxu1 }
0x1117   :  { %v1463_v63 = vadd.f32 %v2756_v41, %v1458_v60  ;;  %v1402_v2 = vpop.f32.mrf.mxu0  ;;  %v3103_v60 = vld [vmem:[%s3206_s4] ss:$0 sm:$0xff] }
0x1118   :  { %v1460_v3 = vpop.f32.mrf.mxu1 }
0x1119   :  { %2547 = vtanh.f32 %v1463_v63  ;;  %v2345_v4 = vpop.f32.mrf.mxu0  ;;  %v2110_v41 = vmul.f32 -1.442695, %v1463_v63 }
0x111a   :  { %v2353_v6 = vpop.f32.mrf.mxu1 }
0x111b   :  { %v1546_v7 = vpop.f32.mrf.mxu0 }
0x111c   :  { %v1552_v8 = vadd.f32 %v2112_v5, %v1546_v7 }
0x111d   :  { %v2360_v10 = vpop.f32.mrf.mxu0 }
0x111e   :  { %2549 = vtanh.f32 %v1552_v8  ;;  %v2116_v15 = vmul.f32 -1.442695, %v1552_v8 }
0x111f   :  { %v1549_v11 = vpop.f32.mrf.mxu0  ;;  %2551 = vpow2.f32 %v2110_v41 }
0x1120   :  { %2553 = vpow2.f32 %v2116_v15 }
0x1121   :  { %v2361_v12 = vpop.f32.mrf.mxu0 }
0x1126   :  { %v2548_v13 = vpop.eup %2547 }
0x1127   :  { %1473 = vrot.lane.b32.xlu0 %v2548_v13, %s2634_s30 }
0x112b   :  { %v2550_v14 = vpop.eup %2549 }
0x112c   :  { %1562 = vrot.lane.b32.xlu1 %v2550_v14, %s2634_s30  ;;  %v2552_v16 = vpop.eup %2551 }
0x112d   :  { %v1467_v17 = vadd.f32 1.0, %v2552_v16  ;;  %v2554_v18 = vpop.eup %2553 }
0x112e   :  { %v1556_v19 = vadd.f32 1.0, %v2554_v18 }
0x112f   :  { %2555 = vrcp.f32 %v1467_v17 }
0x1130   :  { %2557 = vrcp.f32 %v1556_v19 }
0x113c   :  { %v2556_v20 = vpop.eup %2555 }
0x113d   :  { %v2558_v24 = vpop.eup %2557  ;;  %v1471_v27 = vmul.f32 %v2556_v20, %v2993_v38  ;;  %v2453_v38 = vld [vmem:[%s3204_s2] sm:$0xff]  }
0x113e   :  { %v1560_v30 = vmul.f32 %v2558_v24, %v2995_v39  ;;  %2373 = vmatpush3.bf16.msra.mxu0 %v2453_v38 }
0x113f   :  { %2386 = vmatprep.subr.bf16.mxu0 %v2632_v1 }
0x1199   :  { %v1474_v21 = vpop.permute.xlu0 %1473 }
0x119a   :  { %v1476_v23 = vmul.f32 %v2556_v20, %v1474_v21 }
0x119c   :  { %1478 = vrot.lane.b32.xlu0 %v1476_v23, %s2635_s8 }
0x119e   :  { %v1563_v25 = vpop.permute.xlu1 %1562 }
0x119f   :  { %v1565_v26 = vmul.f32 %v2558_v24, %v1563_v25 }
0x11a1   :  { %1567 = vrot.lane.b32.xlu1 %v1565_v26, %s2635_s8 }
0x120e   :  { %v1479_v28 = vpop.permute.xlu0 %1478 }
0x120f   :  { %v3049_v29 = vadd.f32 %v1479_v28, %v1471_v27  ;;  %v2455_v28 = vld [vmem:[%s3205_s3 + $0x8] sm:$0xff]  }
0x1211   :  { %2559 = vtanh.f32 %v3049_v29 }
0x1213   :  { %v1568_v31 = vpop.permute.xlu1 %1567 }
0x1214   :  { %v3053_v32 = vadd.f32 %v1568_v31, %v1560_v30  ;;  %v2456_v30 = vld [vmem:[%s3204_s2 + $0x8] sm:$0xff]   ;;  %v2458_v31 = vld [vmem:[%s3204_s2] sm:$0xff]   ;;  %s2636_s2 = smov 96  }
0x1216   :  { %2561 = vtanh.f32 %v3053_v32 }
0x121e   :  { %v2560_v36 = vpop.eup %2559 }
0x121f   :  { %1484 = vrot.lane.b32.xlu0 %v2560_v36, %s2634_s30 }
0x1223   :  { %v2562_v37 = vpop.eup %2561 }
0x1224   :  { %1573 = vrot.lane.b32.xlu1 %v2562_v37, %s2634_s30 }
0x1291   :  { %v1485_v39 = vpop.permute.xlu0 %1484 }
0x1292   :  { %v3074_v40 = vmul.f32 %v2556_v20, %v1485_v39 }
0x1294   :  { %v1582_v42 = vpack.c.bf16 %v3074_v40, %v3074_v40 }
0x1296   :  { %1588 = vrot.lane.b32.xlu0 %v1582_v42, %s2635_s8  ;;  %v1574_v43 = vpop.permute.xlu1 %1573 }
0x1297   :  { %v1576_v44 = vmul.f32 %v2558_v24, %v1574_v43 }
0x1299   :  { %v1577_v45 = vpack.c.bf16 %v1576_v44, %v1576_v44 }
0x129b   :  { %1646 = vrot.lane.b32.xlu1 %v1577_v45, %s2635_s8 }
0x1308   :  { %v1589_v47 = vpop.permute.xlu0 %1588 }
0x1309   :  { %2367 = vmatmul.mubr.msk.bf16.vlgmr.msra.gmra.mxu1 %vm30_vm1, %v1589_v47 }
0x130a   :  { %2379 = vmatpush3.bf16.msra.mxu1 %v2452_v46  ;;  %2382 = vmatprep.mubr.msk.bf16.mxu1 %vm2633_vm0, %v2632_v1 }
0x130b   :  { %2380 = vmatprep.subr.bf16.mxu1 %v2632_v1 }
0x130d   :  { %v1647_v50 = vpop.permute.xlu1 %1646 }
0x130e   :  { %2381 = vmatpush3.bf16.msra.mxu1 %v2454_v48  ;;  %2375 = vmatmul.mubr.msk.bf16.vlgmr.msra.gmra.mxu0 %vm30_vm1, %v1647_v50 }
0x130f   :  { %2394 = vmatprep.subr.bf16.mxu1 %v2632_v1  ;;  %2390 = vmatprep.mubr.msk.bf16.mxu0 %vm2633_vm0, %v2632_v1 }
0x1310   :  { %2387 = vmatpush3.bf16.msra.mxu0 %v2455_v28 }
0x1311   :  { %2383 = vmatmul.mubr.msk.bf16.vlgmr.msra.gmra.mxu1 %vm30_vm1, %v1647_v50  ;;  %2388 = vmatprep.subr.bf16.mxu0 %v2632_v1 }
0x1312   :  { %2398 = vmatprep.mubr.msk.bf16.mxu1 %vm2633_vm0, %v2632_v1  ;;  %2395 = vmatpush3.bf16.msra.mxu1 %v2456_v30 }
0x1313   :  { %2396 = vmatprep.subr.bf16.mxu1 %v2632_v1 }
0x1316   :  { %2397 = vmatpush3.bf16.msra.mxu1 %v2458_v31 }
0x13c9   :  { %v1639_v51 = vpop.f32.mrf.mxu1 }
0x13cb   :  { %v2368_v52 = vpop.f32.mrf.mxu1 }
0x13cd   :  { %v1642_v53 = vpop.f32.mrf.mxu1 }
0x13ce   :  { %v1697_v54 = vpop.f32.mrf.mxu0 }
0x13cf   :  { %v2369_v56 = vpop.f32.mrf.mxu1  ;;  %v1698_v57 = vadd.f32 %v1697_v54, %v1639_v51 }
0x13d0   :  { %v2376_v59 = vpop.f32.mrf.mxu0 }
0x13d1   :  { %v1703_v61 = vadd.f32 %v3103_v60, %v1698_v57  ;;  %v1786_v62 = vpop.f32.mrf.mxu1 }
0x13d2   :  { %v1792_v63 = vadd.f32 %v2125_v58, %v1786_v62  ;;  %v1700_v2 = vpop.f32.mrf.mxu0 }
0x13d3   :  { %2563 = vtanh.f32 %v1703_v61  ;;  %v2384_v3 = vpop.f32.mrf.mxu1  ;;  %v2123_v10 = vmul.f32 -1.442695, %v1703_v61 }
0x13d4   :  { %2565 = vtanh.f32 %v1792_v63  ;;  %v2377_v4 = vpop.f32.mrf.mxu0  ;;  %v2129_v11 = vmul.f32 -1.442695, %v1792_v63 }
0x13d5   :  { %v1789_v5 = vpop.f32.mrf.mxu1  ;;  %2567 = vpow2.f32 %v2123_v10 }
0x13d6   :  { %2569 = vpow2.f32 %v2129_v11 }
0x13d7   :  { %v2385_v6 = vpop.f32.mrf.mxu1 }
0x13e0   :  { %v2564_v7 = vpop.eup %2563 }
0x13e1   :  { %v2566_v8 = vpop.eup %2565  ;;  %1713 = vrot.lane.b32.xlu0 %v2564_v7, %s2634_s30 }
0x13e2   :  { %1802 = vrot.lane.b32.xlu1 %v2566_v8, %s2634_s30  ;;  %v2568_v12 = vpop.eup %2567 }
0x13e3   :  { %v2570_v13 = vpop.eup %2569  ;;  %v1707_v14 = vadd.f32 1.0, %v2568_v12 }
0x13e4   :  { %v1796_v41 = vadd.f32 1.0, %v2570_v13 }
0x13e5   :  { %2571 = vrcp.f32 %v1707_v14 }
0x13e6   :  { %2573 = vrcp.f32 %v1796_v41 }
0x13f2   :  { %v2572_v15 = vpop.eup %2571 }
0x13f3   :  { %v2574_v17 = vpop.eup %2573  ;;  %v1711_v21 = vmul.f32 %v2572_v15, %v3049_v29  ;;  %v2457_v29 = vld [vmem:[%s3205_s3] sm:$0xff]  }
0x13f4   :  { %v1800_v23 = vmul.f32 %v2574_v17, %v3053_v32  ;;  %2389 = vmatpush3.bf16.msra.mxu0 %v2457_v29 }
0x1453   :  { %v1714_v16 = vpop.permute.xlu0 %1713 }
0x1454   :  { %v1803_v18 = vpop.permute.xlu1 %1802  ;;  %v1716_v19 = vmul.f32 %v2572_v15, %v1714_v16 }
0x1455   :  { %v1805_v20 = vmul.f32 %v2574_v17, %v1803_v18 }
0x1456   :  { %1718 = vrot.lane.b32.xlu0 %v1716_v19, %s2635_s8 }
0x1457   :  { %1807 = vrot.lane.b32.xlu1 %v1805_v20, %s2635_s8 }
0x14c8   :  { %v1719_v24 = vpop.permute.xlu0 %1718 }
0x14c9   :  { %v1808_v25 = vpop.permute.xlu1 %1807  ;;  %v1721_v26 = vadd.f32 %v1719_v24, %v1711_v21 }
0x14ca   :  { %v1810_v27 = vadd.f32 %v1808_v25, %v1800_v23 }
0x14cb   :  { %2575 = vtanh.f32 %v1721_v26 }
0x14cc   :  { %2577 = vtanh.f32 %v1810_v27 }
0x14d8   :  { %v2576_v32 = vpop.eup %2575 }
0x14d9   :  { %v2578_v33 = vpop.eup %2577  ;;  %1724 = vrot.lane.b32.xlu0 %v2576_v32, %s2634_s30 }
0x14da   :  { %1813 = vrot.lane.b32.xlu1 %v2578_v33, %s2634_s30 }
0x154b   :  { %v1725_v34 = vpop.permute.xlu0 %1724 }
0x154c   :  { %v1814_v35 = vpop.permute.xlu1 %1813  ;;  %v3128_v36 = vmul.f32 %v2572_v15, %v1725_v34 }
0x154d   :  { %v1816_v37 = vmul.f32 %v2574_v17, %v1814_v35 }
0x154e   :  { %v1822_v38 = vpack.c.bf16 %v3128_v36, %v3128_v36 }
0x154f   :  { %v1817_v39 = vpack.c.bf16 %v1816_v37, %v1816_v37 }
0x1550   :  { %1828 = vrot.lane.b32.xlu0 %v1822_v38, %s2635_s8 }
0x1551   :  { %1886 = vrot.lane.b32.xlu1 %v1817_v39, %s2635_s8 }
0x15c2   :  { %v1829_v1 = vpop.permute.xlu0 %1828 }
0x15c3   :  { %v1887_v42 = vpop.permute.xlu1 %1886  ;;  %2391 = vmatmul.mubr.msk.bf16.vlgmr.msra.gmra.mxu0 %vm30_vm1, %v1829_v1 }
0x15c4   :  { %2399 = vmatmul.mubr.msk.bf16.vlgmr.msra.gmra.mxu1 %vm30_vm1, %v1887_v42 }
0x1683   :  { %v1879_v43 = vpop.f32.mrf.mxu0 }
0x1684   :  { %v1937_v44 = vpop.f32.mrf.mxu1 }
0x1685   :  { %v1938_v45 = vadd.f32 %v1937_v44, %v1879_v43  ;;  %v2392_v46 = vpop.f32.mrf.mxu0 }
0x1686   :  { %v2400_v47 = vpop.f32.mrf.mxu1 }
0x1687   :  { %v1943_v48 = vadd.f32 %v3103_v60, %v1938_v45  ;;  %v1882_v50 = vpop.f32.mrf.mxu0 }
0x1688   :  { %v1940_v51 = vpop.f32.mrf.mxu1 }
0x1689   :  { %2579 = vtanh.f32 %v1943_v48  ;;  %v2393_v52 = vpop.f32.mrf.mxu0  ;;  %v2136_v56 = vmul.f32 -1.442695, %v1943_v48 }
0x168a   :  { %v2401_v53 = vpop.f32.mrf.mxu1 }
0x168b   :  { %2581 = vpow2.f32 %v2136_v56 }
0x1696   :  { %v2580_v54 = vpop.eup %2579 }
0x1697   :  { %1953 = vrot.lane.b32.xlu0 %v2580_v54, %s2634_s30 }
0x1698   :  { %v2582_v57 = vpop.eup %2581 }
0x1699   :  { %v1947_v58 = vadd.f32 1.0, %v2582_v57 }
0x169b   :  { %2583 = vrcp.f32 %v1947_v58 }
0x16a8   :  { %v2584_v59 = vpop.eup %2583 }
0x16a9   :  { %v1951_v60 = vmul.f32 %v2584_v59, %v1721_v26 }
0x1709   :  { %v1954_v61 = vpop.permute.xlu0 %1953 }
0x170a   :  { %v1956_v62 = vmul.f32 %v2584_v59, %v1954_v61 }
0x170c   :  { %1958 = vrot.lane.b32.xlu1 %v1956_v62, %s2635_s8 }
0x1710   :  { %1980 = vrot.lane.b32.xlu1 %v1810_v27, %s2636_s2 }
0x1714   :  { %290 = vrot.lane.b32.xlu1 %v2789_v22, %s2635_s8 }
0x1718   :  { %769 = vrot.lane.b32.xlu1 %v2903_v0, %s2635_s8 }
0x171c   :  { %1249 = vrot.lane.b32.xlu1 %v3017_v49, %s2635_s8 }
0x177e   :  { %v1959_v63 = vpop.permute.xlu1 %1958 }
0x177f   :  { %v1961_v2 = vadd.f32 %v1959_v63, %v1951_v60 }
0x1781   :  { %2585 = vtanh.f32 %v1961_v2 }
0x1782   :  { %v1981_v3 = vpop.permute.xlu1 %1980 }
0x1783   :  { %1983 = vst.msk [vmem:[#allocation3] sm:$0xff] %vm30_vm1, %v1981_v3  ;;  %1996 = vst.msk [vmem:[#allocation8] sm:$0xff] %vm30_vm1, %v1981_v3 }
0x1786   :  { %v291_v4 = vpop.permute.xlu1 %290 }
0x1787   :  { %293 = vst.msk [vmem:[%s3207_s5] sm:$0xff] %vm30_vm1, %v291_v4 }
0x178a   :  { %v770_v22 = vpop.permute.xlu1 %769 }
0x178b   :  { %2072 = vst.msk [vmem:[%s3207_s5 + $0x10] sm:$0xff] %vm30_vm1, %v770_v22 }
0x178e   :  { %v2586_v0 = vpop.eup %2585  ;;  %v1250_v49 = vpop.permute.xlu1 %1249 }
0x178f   :  { %2098 = vst.msk [vmem:[%s3207_s5 + $0x20] sm:$0xff] %vm30_vm1, %v1250_v49  ;;  %1964 = vrot.lane.b32.xlu0 %v2586_v0, %s2634_s30  ;;  %s2588_s30 = scalar_lea.vmem %s2019_s17, 256 }
0x1790   :  { %p2589_p0 = scmp.ne.s32.totalorder %s2019_s17, %s2588_s30  ;;  %p2594_p2 = scmp.lt.s32.totalorder %s2588_s30, %s2588_s30 }
0x1792   :  { %p2595_p3 = por %p2594_p2, %p2593_p1 }
0x1793   :  { %1975 = vrot.lane.b32.xlu0 %v1816_v37, %s2635_s8 }
0x1794   :  { %p2596_p4 = pnand %p2595_p3, %p2589_p0 }
0x1797   :  { %1986 = vrot.lane.b32.xlu0 %v1961_v2, %s2636_s2 }
0x179b   :  { %529 = vrot.lane.b32.xlu0 %v2846_v9, %s2635_s8 }
0x179f   :  { %1009 = vrot.lane.b32.xlu0 %v2960_v55, %s2635_s8 }
0x17a3   :  { %1489 = vrot.lane.b32.xlu0 %v3074_v40, %s2635_s8 }
0x1801   :  { %v1965_v5 = vpop.permute.xlu0 %1964 }
0x1802   :  { %v1967_v6 = vmul.f32 %v2584_v59, %v1965_v5 }
0x1804   :  { %1969 = vrot.lane.b32.xlu1 %v1967_v6, %s2635_s8 }
0x1805   :  { %v1976_v7 = vpop.permute.xlu0 %1975 }
0x1806   :  { %1978 = vst.msk [vmem:[#allocation2] sm:$0xff] %vm30_vm1, %v1976_v7  ;;  %1993 = vst.msk [vmem:[#allocation6] sm:$0xff] %vm30_vm1, %v1976_v7 }
0x1808   :  { %1729 = vrot.lane.b32.xlu1 %v3128_v36, %s2635_s8 }
0x1809   :  { %v1987_v9 = vpop.permute.xlu0 %1986 }
0x180a   :  { %1989 = vst.msk [vmem:[#allocation5] sm:$0xff] %vm30_vm1, %v1987_v9  ;;  %1998 = vst.msk [vmem:[#allocation8 + $0x8] sm:$0xff] %vm30_vm1, %v1987_v9 }
0x180b   :  { %2599 = shalt.err (!%p2596_p4)
}
0x180c   :  { %s2638_s18 = smov 128   ;;  %s2639_s19 = smov 8  }
0x180d   :  { %2024 = dma.vmem_to_hbm [thread:$0]  %s2019_s17, 256, %s3209_s7, [#allocation9], %s2638_s18, %s2638_s18, %s2639_s19   ;;  %v530_v55 = vpop.permute.xlu0 %529 }
0x180e   :  { %2059 = vst.msk [vmem:[%s3207_s5 + $0x8] sm:$0xff] %vm30_vm1, %v530_v55  ;;  %s2640_s0 = smov [#allocation6]  }
0x180f   :  { %s2006_s7 = sshll.u32 %s2640_s0, 4  ;;  %s2007_s7 = int_to_ptr.vmem [resolvable:$true] %s2006_s7 }
0x1810   :  { %s2608_s27 = scalar_lea.vmem %s2007_s7, 256  ;;  %p2613_p6 = scmp.lt.s32.totalorder %s2007_s7, %s2007_s7 }
0x1811   :  { %v1010_v40 = vpop.permute.xlu0 %1009  ;;  %p2609_p5 = scmp.ne.s32.totalorder %s2007_s7, %s2608_s27  ;;  %p2614_p7 = scmp.lt.s32.totalorder %s2608_s27, %s2608_s27 }
0x1812   :  { %2085 = vst.msk [vmem:[%s3207_s5 + $0x18] sm:$0xff] %vm30_vm1, %v1010_v40 }
0x1813   :  { %p2615_p8 = por %p2614_p7, %p2613_p6 }
0x1815   :  { %v1490_v8 = vpop.permute.xlu0 %1489  ;;  %p2616_p9 = pnand %p2615_p8, %p2609_p5 }
0x1816   :  { %2111 = vst.msk [vmem:[%s3207_s5 + $0x28] sm:$0xff] %vm30_vm1, %v1490_v8 }
0x1876   :  { %v1970_v10 = vpop.permute.xlu1 %1969 }
0x1877   :  { %2137 = vst.msk [vmem:[%s3207_s5 + $0x38] sm:$0xff] %vm30_vm1, %v1970_v10  ;;  %1984 = vst.msk [vmem:[#allocation4] sm:$0xff] %vm30_vm1, %v1970_v10 }
0x1878   :  { %1995 = vst.msk [vmem:[#allocation6 + $0x8] sm:$0xff] %vm30_vm1, %v1970_v10 }
0x1879   :  { %2619 = shalt.err (!%p2616_p9)
}
0x187a   :  { %2012 = dma.vmem_to_hbm [thread:$0]  %s2007_s7, 256, %s3208_s6, [#allocation7], %s2638_s18, %s2638_s18, %s2639_s19   ;;  %v1730_v11 = vpop.permute.xlu1 %1729 }
0x187b   :  { %2124 = vst.msk [vmem:[%s3207_s5 + $0x30] sm:$0xff] %vm30_vm1, %v1730_v11 }
0x187c   :  { %2628 = dma.done.wait [#allocation7], 256  }
0x187d   :  { %2629 = vsyncadd [#allocation7], 4294967040 }
0x187e   :  { %2630 = dma.done.wait [#allocation9], 256  }
0x187f   :  { %2631 = vsyncadd [#allocation9], 4294967040 }
0x1880   :  { %2033 = vsyncpa [#allocation7], 1 }
0x1881   :  { %2034 = vsyncpa [#allocation9], 1 }

</bundles_post_ra>
